<compile_context>
chip_gen: v7x
topology: tpu7x:2x2x1
jax: 0.10.0
libtpu: 0.0.40
codegen_flags: <defaults>
</compile_context>

<pallas_src>
import functools

import jax
import jax.numpy as jnp
from jax.experimental import pallas as pl
from jax.experimental.pallas import tpu as pltpu


def model_kernel(x2d_ref, feat_ref,
                 wih_ref, bih_ref, whh_ref, bhh_ref,
                 wconv_ref, bconv_ref,
                 w1_ref, b1_ref, alpha_ref,
                 bng_ref, bnb_ref, bnm_ref, bnv_ref,
                 w2_ref, b2_ref,
                 out_ref, *, L, B, H, KN, KS):
    f32 = jnp.float32
    bf16 = jnp.bfloat16
    H2, H4 = 2 * H, 4 * H
    P = 2 * H - KS + 1                    # Conv1d output length

    # ---- hoisted input-to-hidden projection, both directions, all timesteps --
    # x2d row i*B+b = [x[t=i, b] | x[t=L-1-i, b]]  (fwd / bwd inputs side by side)
    # gate column layout of all combined weights: [r_f | r_b | z_f | z_b | n_f | n_b]
    xg_all = jnp.dot(x2d_ref[...], wih_ref[...],
                     preferred_element_type=f32) + bih_ref[...]        # (L*B, 6H)

    w_hh = whh_ref[...]                   # (2H, 6H) bf16, block-diag over dirs
    b_hh = bhh_ref[...]                   # (1, 6H)  f32

    # ---- merged bidirectional GRU recurrence (fully unrolled, L steps) -------
    h = jnp.zeros((B, H2), f32)           # [h_fwd | h_bwd]
    h_steps = []
    for i in range(L):
        xg = xg_all[i * B:(i + 1) * B, :]                              # (B, 6H)
        hg = jnp.dot(h.astype(bf16), w_hh,
                     preferred_element_type=f32) + b_hh                # (B, 6H)
        rz = jax.nn.sigmoid(xg[:, :H4] + hg[:, :H4])   # fused r/z, both dirs
        r = rz[:, :H2]                                 # [r_f | r_b]
        z = rz[:, H2:]                                 # [z_f | z_b]
        n = jnp.tanh(xg[:, H4:] + r * hg[:, H4:])      # [n_f | n_b]
        h = (1.0 - z) * n + z * h
        h_steps.append(h)

    # ---- gather GRU outputs time-major: fwd half in step order, bwd reversed --
    hall_f = jnp.stack(h_steps, axis=0)                # (L, B, 2H)
    hall_r = jnp.stack(h_steps[::-1], axis=0)          # (L, B, 2H)
    lane = jax.lax.broadcasted_iota(jnp.int32, (1, 1, H2), 2)
    hr = jnp.where(lane < H, hall_f, hall_r)           # (L, B, 2H) == torch h_rnn

    # ---- Conv1d(in_channels=L) over the 2H axis + max over KN channels -------
    # one matmul for all batches and all taps:
    #   conv_all[k*KN + n, b*2H + j] = sum_l w_conv[n, l, k] * hr[l, b, j]
    hr_wide = jnp.concatenate([hr[:, b, :] for b in range(B)],
                              axis=-1).astype(bf16)                    # (L, B*2H)
    conv_all = jnp.dot(wconv_ref[...], hr_wide,
                       preferred_element_type=f32)                     # (KS*KN, B*2H)
    acc = conv_all[0:KN, :]
    for k in range(1, KS):
        blk = conv_all[k * KN:(k + 1) * KN, :]
        # left-rotate by k lanes; used lanes (p < P) never cross a b-block.
        acc = acc + jnp.concatenate([blk[:, k:], blk[:, :k]], axis=-1)
    conv = acc + bconv_ref[...]                                        # (KN, B*2H)
    pooled = jnp.max(conv, axis=0, keepdims=True)                      # (1, B*2H)
    max_pool = jnp.concatenate(
        [pooled[:, b * H2:b * H2 + P] for b in range(B)], axis=0)      # (B, P)

    # ---- concat(features) -> Linear -> PReLU -> Dropout(eval) -> BN(eval) ----
    conc = jnp.concatenate([max_pool, feat_ref[...]], axis=-1)         # (B, conc)
    h1 = jnp.dot(conc.astype(bf16), w1_ref[...],
                 preferred_element_type=f32) + b1_ref[...]             # (B, 32)
    alpha = alpha_ref[...]                                             # (1, 1)
    h1 = jnp.where(h1 >= 0.0, h1, alpha * h1)                          # PReLU
    # nn.Dropout(0.1): identity in eval mode.
    eps = 1e-5
    h1 = ((h1 - bnm_ref[...])
          * (bng_ref[...] * jax.lax.rsqrt(bnv_ref[...] + eps))
          + bnb_ref[...])

    # ---- output head: Linear(32, 1) -> sigmoid ----
    logits = jnp.dot(h1.astype(bf16), w2_ref[...],
                     preferred_element_type=f32) + b2_ref[...]         # (B, 1)
    out_ref[...] = jax.nn.sigmoid(logits)


def neural_net_features_conv(seq, features, params):
    """seq: (B, L) int32 token ids, features: (B, n_features) float32."""
    emb_table = params["embedding"]
    B, L = seq.shape
    E = emb_table.shape[1]
    H = params["w_hh_f"].shape[1]
    KN, _, KS = params["w_conv"].shape
    f32, bf16 = jnp.float32, jnp.bfloat16

    # ---- glue: embedding lookup (Dropout2d is identity in eval), time-major --
    h_emb = jnp.take(emb_table, seq, axis=0).astype(f32)               # (B, L, E)
    x_tm = jnp.transpose(h_emb, (1, 0, 2))                             # (L, B, E)
    # forward input at merged step i is x[i]; backward input is x[L-1-i]
    x_merged = jnp.concatenate([x_tm, x_tm[::-1]], axis=-1)            # (L, B, 2E)
    x2d = x_merged.reshape(L * B, 2 * E).astype(bf16)                  # (L*B, 2E)

    # ---- pack GRU weights: gate columns [r_f | r_b | z_f | z_b | n_f | n_b] --
    def blocks(w):                       # (3H, X) -> (X, H) blocks r, z, n
        return w[0:H].T, w[H:2 * H].T, w[2 * H:3 * H].T

    rf, zf, nf = blocks(params["w_ih_f"])
    rb, zb, nb = blocks(params["w_ih_b"])
    ze = jnp.zeros((E, H), f32)
    w_ih_big = jnp.concatenate(
        [jnp.concatenate([rf, ze, zf, ze, nf, ze], axis=1),            # rows: x_fwd
         jnp.concatenate([ze, rb, ze, zb, ze, nb], axis=1)],           # rows: x_bwd
        axis=0).astype(bf16)                                           # (2E, 6H)

    hrf, hzf, hnf = blocks(params["w_hh_f"])
    hrb, hzb, hnb = blocks(params["w_hh_b"])
    zh = jnp.zeros((H, H), f32)
    w_hh_blk = jnp.concatenate(
        [jnp.concatenate([hrf, zh, hzf, zh, hnf, zh], axis=1),         # rows: h_fwd
         jnp.concatenate([zh, hrb, zh, hzb, zh, hnb], axis=1)],        # rows: h_bwd
        axis=0).astype(bf16)                                           # (2H, 6H)

    def bias6(bf, bb):                   # (1, 3H) x2 -> (1, 6H) in gate order
        return jnp.concatenate([bf[:, 0:H], bb[:, 0:H],
                                bf[:, H:2 * H], bb[:, H:2 * H],
                                bf[:, 2 * H:3 * H], bb[:, 2 * H:3 * H]], axis=1)

    b_ih = bias6(params["b_ih_f"], params["b_ih_b"])                   # (1, 6H)
    b_hh = bias6(params["b_hh_f"], params["b_hh_b"])                   # (1, 6H)

    # ---- conv weight: row k*KN + n = w_conv[n, :, k] ----
    w_conv_flat = jnp.transpose(params["w_conv"], (2, 0, 1)).reshape(KS * KN, L)
    w_conv_flat = w_conv_flat.astype(bf16)                             # (KS*KN, L)

    w1t = params["w1"].T.astype(bf16)                                  # (conc, 32)
    w2t = params["w2"].T.astype(bf16)                                  # (32, 1)

    # Everything (weights + activations) is a few tens of KB -> keep whole
    # arrays resident in VMEM, single kernel invocation, no grid / pipelining.
    vmem = pl.BlockSpec(memory_space=pltpu.MemorySpace.VMEM)
    kernel = functools.partial(model_kernel, L=L, B=B, H=H, KN=KN, KS=KS)
    out = pl.pallas_call(
        kernel,
        out_shape=jax.ShapeDtypeStruct((B, 1), jnp.float32),
        in_specs=[vmem] * 17,
        out_specs=vmem,
    )(x2d, features.astype(f32),
      w_ih_big, b_ih, w_hh_blk, b_hh,
      w_conv_flat, params["b_conv"],
      w1t, params["b1"], params["alpha"],
      params["bn_gamma"], params["bn_beta"], params["bn_mean"], params["bn_var"],
      w2t, params["b2"])
    return out


def init_params(key, vocab, L, E, H, KN, KS, n_features):
    assert H == L, "module's conc_size assumes hidden_size == max_seq_len"
    keys = jax.random.split(key, 16)

    def u(k, shape, scale=0.1):
        return jax.random.uniform(k, shape, jnp.float32, -1.0, 1.0) * scale

    conc_size = 2 * L - KS + 1 + n_features
    return dict(
        embedding=u(keys[0], (vocab, E), 1.0),
        # GRU, forward direction (weight_ih_l0, weight_hh_l0, biases), [r|z|n]
        w_ih_f=u(keys[1], (3 * H, E)), w_hh_f=u(keys[2], (3 * H, H)),
        b_ih_f=u(keys[3], (1, 3 * H)), b_hh_f=u(keys[4], (1, 3 * H)),
        # GRU, reverse direction
        w_ih_b=u(keys[5], (3 * H, E)), w_hh_b=u(keys[6], (3 * H, H)),
        b_ih_b=u(keys[7], (1, 3 * H)), b_hh_b=u(keys[8], (1, 3 * H)),
        # Conv1d(max_seq_len, kn, ks)
        w_conv=u(keys[9], (KN, L, KS)), b_conv=u(keys[10], (KN, 1)),
        # Linear(conc_size, 32)
        w1=u(keys[11], (32, conc_size)), b1=u(keys[12], (1, 32)),
        # PReLU (single slope, PyTorch default 0.25)
        alpha=jnp.full((1, 1), 0.25, jnp.float32),
        # BatchNorm1d(32), PyTorch defaults (eval-mode running stats)
        bn_gamma=jnp.ones((1, 32), jnp.float32),
        bn_beta=jnp.zeros((1, 32), jnp.float32),
        bn_mean=jnp.zeros((1, 32), jnp.float32),
        bn_var=jnp.ones((1, 32), jnp.float32),
        # Linear(32, 1)
        w2=u(keys[13], (1, 32)), b2=u(keys[14], (1, 1)),
    )


if __name__ == "__main__":
    B, L, E, H = 4, 16, 32, 16      # hidden_size == max_seq_len (see note above)
    KN, KS = 8, 3
    n_features = 1
    vocab = 100

    key = jax.random.PRNGKey(0)
    k_param, k_seq, k_feat = jax.random.split(key, 3)

    params = init_params(k_param, vocab, L, E, H, KN, KS, n_features)
    seq = jax.random.randint(k_seq, (B, L), 0, vocab, dtype=jnp.int32)
    features = jax.random.normal(k_feat, (B, n_features), dtype=jnp.float32)

    fwd = jax.jit(neural_net_features_conv)
    out = fwd(seq, features, params)
    out = jax.block_until_ready(out)

    assert out.shape == (B, 1), out.shape
    assert bool(jnp.all(jnp.isfinite(out)))
    assert bool(jnp.all((out >= 0.0) & (out <= 1.0)))   # sigmoid output range
    print("KERNEL_OK")
</pallas_src>

<mosaic_0001>
module attributes {stable_mosaic.version = 11 : i64} {
  func.func @model_kernel(%arg0: memref<64x64xbf16, #tpu.memory_space<vmem>>, %arg1: memref<4x1xf32, #tpu.memory_space<vmem>>, %arg2: memref<64x96xbf16, #tpu.memory_space<vmem>>, %arg3: memref<1x96xf32, #tpu.memory_space<vmem>>, %arg4: memref<32x96xbf16, #tpu.memory_space<vmem>>, %arg5: memref<1x96xf32, #tpu.memory_space<vmem>>, %arg6: memref<24x16xbf16, #tpu.memory_space<vmem>>, %arg7: memref<8x1xf32, #tpu.memory_space<vmem>>, %arg8: memref<31x32xbf16, #tpu.memory_space<vmem>>, %arg9: memref<1x32xf32, #tpu.memory_space<vmem>>, %arg10: memref<1x1xf32, #tpu.memory_space<vmem>>, %arg11: memref<1x32xf32, #tpu.memory_space<vmem>>, %arg12: memref<1x32xf32, #tpu.memory_space<vmem>>, %arg13: memref<1x32xf32, #tpu.memory_space<vmem>>, %arg14: memref<1x32xf32, #tpu.memory_space<vmem>>, %arg15: memref<32x1xbf16, #tpu.memory_space<vmem>>, %arg16: memref<1x1xf32, #tpu.memory_space<vmem>>, %arg17: memref<4x1xf32, #tpu.memory_space<vmem>>) attributes {dimension_semantics = [], scalar_prefetch = 0 : i64, scratch_operands = 0 : i64, tpu.core_type = #tpu.core_type<tc>} {
    %c0 = arith.constant 0 : index
    %c0_0 = arith.constant 0 : index
    %0 = vector.load %arg0[%c0, %c0_0] : memref<64x64xbf16, #tpu.memory_space<vmem>>, vector<64x64xbf16>
    %c0_1 = arith.constant 0 : index
    %c0_2 = arith.constant 0 : index
    %1 = vector.load %arg2[%c0_1, %c0_2] : memref<64x96xbf16, #tpu.memory_space<vmem>>, vector<64x96xbf16>
    %cst = arith.constant dense<0.000000e+00> : vector<64x96xf32>
    %2 = tpu.matmul %0, %1, %cst {dimension_numbers = #tpu.dot_dimension_numbers<[1], [0], [0], [1], [0, 0, 1, 1], [], []>} : vector<64x64xbf16>, vector<64x96xbf16>, vector<64x96xf32> -> vector<64x96xf32>
    %c0_3 = arith.constant 0 : index
    %c0_4 = arith.constant 0 : index
    %3 = vector.load %arg3[%c0_3, %c0_4] : memref<1x96xf32, #tpu.memory_space<vmem>>, vector<1x96xf32>
    %4 = vector.broadcast %3 : vector<1x96xf32> to vector<64x96xf32>
    %5 = arith.addf %2, %4 : vector<64x96xf32>
    %c0_5 = arith.constant 0 : index
    %c0_6 = arith.constant 0 : index
    %6 = vector.load %arg4[%c0_5, %c0_6] : memref<32x96xbf16, #tpu.memory_space<vmem>>, vector<32x96xbf16>
    %c0_7 = arith.constant 0 : index
    %c0_8 = arith.constant 0 : index
    %7 = vector.load %arg5[%c0_7, %c0_8] : memref<1x96xf32, #tpu.memory_space<vmem>>, vector<1x96xf32>
    %cst_9 = arith.constant 0.000000e+00 : f32
    %8 = vector.broadcast %cst_9 : f32 to vector<4x32xf32>
    %9 = vector.extract_strided_slice %5 {offsets = [0, 0], sizes = [4, 96], strides = [1, 1]} : vector<64x96xf32> to vector<4x96xf32>
    %10 = arith.truncf %8 : vector<4x32xf32> to vector<4x32xbf16>
    %cst_10 = arith.constant dense<0.000000e+00> : vector<4x96xf32>
    %11 = tpu.matmul %10, %6, %cst_10 {dimension_numbers = #tpu.dot_dimension_numbers<[1], [0], [0], [1], [0, 0, 1, 1], [], []>} : vector<4x32xbf16>, vector<32x96xbf16>, vector<4x96xf32> -> vector<4x96xf32>
    %12 = vector.broadcast %7 : vector<1x96xf32> to vector<4x96xf32>
    %13 = arith.addf %11, %12 : vector<4x96xf32>
    %14 = vector.extract_strided_slice %9 {offsets = [0, 0], sizes = [4, 64], strides = [1, 1]} : vector<4x96xf32> to vector<4x64xf32>
    %15 = vector.extract_strided_slice %13 {offsets = [0, 0], sizes = [4, 64], strides = [1, 1]} : vector<4x96xf32> to vector<4x64xf32>
    %16 = arith.addf %14, %15 : vector<4x64xf32>
    %17 = arith.negf %16 : vector<4x64xf32>
    %18 = math.exp %17 : vector<4x64xf32>
    %cst_11 = arith.constant 1.000000e+00 : f32
    %19 = vector.broadcast %cst_11 : f32 to vector<4x64xf32>
    %20 = arith.addf %19, %18 : vector<4x64xf32>
    %21 = arith.divf %19, %20 : vector<4x64xf32>
    %22 = vector.extract_strided_slice %21 {offsets = [0, 0], sizes = [4, 32], strides = [1, 1]} : vector<4x64xf32> to vector<4x32xf32>
    %23 = vector.extract_strided_slice %21 {offsets = [0, 32], sizes = [4, 32], strides = [1, 1]} : vector<4x64xf32> to vector<4x32xf32>
    %24 = vector.extract_strided_slice %9 {offsets = [0, 64], sizes = [4, 32], strides = [1, 1]} : vector<4x96xf32> to vector<4x32xf32>
    %25 = vector.extract_strided_slice %13 {offsets = [0, 64], sizes = [4, 32], strides = [1, 1]} : vector<4x96xf32> to vector<4x32xf32>
    %26 = arith.mulf %22, %25 : vector<4x32xf32>
    %27 = arith.addf %24, %26 : vector<4x32xf32>
    %28 = math.tanh %27 : vector<4x32xf32>
    %cst_12 = arith.constant 1.000000e+00 : f32
    %29 = vector.broadcast %cst_12 : f32 to vector<4x32xf32>
    %30 = arith.subf %29, %23 : vector<4x32xf32>
    %31 = arith.mulf %30, %28 : vector<4x32xf32>
    %32 = arith.mulf %23, %8 : vector<4x32xf32>
    %33 = arith.addf %31, %32 : vector<4x32xf32>
    %34 = vector.extract_strided_slice %5 {offsets = [4, 0], sizes = [4, 96], strides = [1, 1]} : vector<64x96xf32> to vector<4x96xf32>
    %35 = arith.truncf %33 : vector<4x32xf32> to vector<4x32xbf16>
    %cst_13 = arith.constant dense<0.000000e+00> : vector<4x96xf32>
    %36 = tpu.matmul %35, %6, %cst_13 {dimension_numbers = #tpu.dot_dimension_numbers<[1], [0], [0], [1], [0, 0, 1, 1], [], []>} : vector<4x32xbf16>, vector<32x96xbf16>, vector<4x96xf32> -> vector<4x96xf32>
    %37 = vector.broadcast %7 : vector<1x96xf32> to vector<4x96xf32>
    %38 = arith.addf %36, %37 : vector<4x96xf32>
    %39 = vector.extract_strided_slice %34 {offsets = [0, 0], sizes = [4, 64], strides = [1, 1]} : vector<4x96xf32> to vector<4x64xf32>
    %40 = vector.extract_strided_slice %38 {offsets = [0, 0], sizes = [4, 64], strides = [1, 1]} : vector<4x96xf32> to vector<4x64xf32>
    %41 = arith.addf %39, %40 : vector<4x64xf32>
    %42 = arith.negf %41 : vector<4x64xf32>
    %43 = math.exp %42 : vector<4x64xf32>
    %cst_14 = arith.constant 1.000000e+00 : f32
    %44 = vector.broadcast %cst_14 : f32 to vector<4x64xf32>
    %45 = arith.addf %44, %43 : vector<4x64xf32>
    %46 = arith.divf %44, %45 : vector<4x64xf32>
    %47 = vector.extract_strided_slice %46 {offsets = [0, 0], sizes = [4, 32], strides = [1, 1]} : vector<4x64xf32> to vector<4x32xf32>
    %48 = vector.extract_strided_slice %46 {offsets = [0, 32], sizes = [4, 32], strides = [1, 1]} : vector<4x64xf32> to vector<4x32xf32>
    %49 = vector.extract_strided_slice %34 {offsets = [0, 64], sizes = [4, 32], strides = [1, 1]} : vector<4x96xf32> to vector<4x32xf32>
    %50 = vector.extract_strided_slice %38 {offsets = [0, 64], sizes = [4, 32], strides = [1, 1]} : vector<4x96xf32> to vector<4x32xf32>
    %51 = arith.mulf %47, %50 : vector<4x32xf32>
    %52 = arith.addf %49, %51 : vector<4x32xf32>
    %53 = math.tanh %52 : vector<4x32xf32>
    %cst_15 = arith.constant 1.000000e+00 : f32
    %54 = vector.broadcast %cst_15 : f32 to vector<4x32xf32>
    %55 = arith.subf %54, %48 : vector<4x32xf32>
    %56 = arith.mulf %55, %53 : vector<4x32xf32>
    %57 = arith.mulf %48, %33 : vector<4x32xf32>
    %58 = arith.addf %56, %57 : vector<4x32xf32>
    %59 = vector.extract_strided_slice %5 {offsets = [8, 0], sizes = [4, 96], strides = [1, 1]} : vector<64x96xf32> to vector<4x96xf32>
    %60 = arith.truncf %58 : vector<4x32xf32> to vector<4x32xbf16>
    %cst_16 = arith.constant dense<0.000000e+00> : vector<4x96xf32>
    %61 = tpu.matmul %60, %6, %cst_16 {dimension_numbers = #tpu.dot_dimension_numbers<[1], [0], [0], [1], [0, 0, 1, 1], [], []>} : vector<4x32xbf16>, vector<32x96xbf16>, vector<4x96xf32> -> vector<4x96xf32>
    %62 = vector.broadcast %7 : vector<1x96xf32> to vector<4x96xf32>
    %63 = arith.addf %61, %62 : vector<4x96xf32>
    %64 = vector.extract_strided_slice %59 {offsets = [0, 0], sizes = [4, 64], strides = [1, 1]} : vector<4x96xf32> to vector<4x64xf32>
    %65 = vector.extract_strided_slice %63 {offsets = [0, 0], sizes = [4, 64], strides = [1, 1]} : vector<4x96xf32> to vector<4x64xf32>
    %66 = arith.addf %64, %65 : vector<4x64xf32>
    %67 = arith.negf %66 : vector<4x64xf32>
    %68 = math.exp %67 : vector<4x64xf32>
    %cst_17 = arith.constant 1.000000e+00 : f32
    %69 = vector.broadcast %cst_17 : f32 to vector<4x64xf32>
    %70 = arith.addf %69, %68 : vector<4x64xf32>
    %71 = arith.divf %69, %70 : vector<4x64xf32>
    %72 = vector.extract_strided_slice %71 {offsets = [0, 0], sizes = [4, 32], strides = [1, 1]} : vector<4x64xf32> to vector<4x32xf32>
    %73 = vector.extract_strided_slice %71 {offsets = [0, 32], sizes = [4, 32], strides = [1, 1]} : vector<4x64xf32> to vector<4x32xf32>
    %74 = vector.extract_strided_slice %59 {offsets = [0, 64], sizes = [4, 32], strides = [1, 1]} : vector<4x96xf32> to vector<4x32xf32>
    %75 = vector.extract_strided_slice %63 {offsets = [0, 64], sizes = [4, 32], strides = [1, 1]} : vector<4x96xf32> to vector<4x32xf32>
    %76 = arith.mulf %72, %75 : vector<4x32xf32>
    %77 = arith.addf %74, %76 : vector<4x32xf32>
    %78 = math.tanh %77 : vector<4x32xf32>
    %cst_18 = arith.constant 1.000000e+00 : f32
    %79 = vector.broadcast %cst_18 : f32 to vector<4x32xf32>
    %80 = arith.subf %79, %73 : vector<4x32xf32>
    %81 = arith.mulf %80, %78 : vector<4x32xf32>
    %82 = arith.mulf %73, %58 : vector<4x32xf32>
    %83 = arith.addf %81, %82 : vector<4x32xf32>
    %84 = vector.extract_strided_slice %5 {offsets = [12, 0], sizes = [4, 96], strides = [1, 1]} : vector<64x96xf32> to vector<4x96xf32>
    %85 = arith.truncf %83 : vector<4x32xf32> to vector<4x32xbf16>
    %cst_19 = arith.constant dense<0.000000e+00> : vector<4x96xf32>
    %86 = tpu.matmul %85, %6, %cst_19 {dimension_numbers = #tpu.dot_dimension_numbers<[1], [0], [0], [1], [0, 0, 1, 1], [], []>} : vector<4x32xbf16>, vector<32x96xbf16>, vector<4x96xf32> -> vector<4x96xf32>
    %87 = vector.broadcast %7 : vector<1x96xf32> to vector<4x96xf32>
    %88 = arith.addf %86, %87 : vector<4x96xf32>
    %89 = vector.extract_strided_slice %84 {offsets = [0, 0], sizes = [4, 64], strides = [1, 1]} : vector<4x96xf32> to vector<4x64xf32>
    %90 = vector.extract_strided_slice %88 {offsets = [0, 0], sizes = [4, 64], strides = [1, 1]} : vector<4x96xf32> to vector<4x64xf32>
    %91 = arith.addf %89, %90 : vector<4x64xf32>
    %92 = arith.negf %91 : vector<4x64xf32>
    %93 = math.exp %92 : vector<4x64xf32>
    %cst_20 = arith.constant 1.000000e+00 : f32
    %94 = vector.broadcast %cst_20 : f32 to vector<4x64xf32>
    %95 = arith.addf %94, %93 : vector<4x64xf32>
    %96 = arith.divf %94, %95 : vector<4x64xf32>
    %97 = vector.extract_strided_slice %96 {offsets = [0, 0], sizes = [4, 32], strides = [1, 1]} : vector<4x64xf32> to vector<4x32xf32>
    %98 = vector.extract_strided_slice %96 {offsets = [0, 32], sizes = [4, 32], strides = [1, 1]} : vector<4x64xf32> to vector<4x32xf32>
    %99 = vector.extract_strided_slice %84 {offsets = [0, 64], sizes = [4, 32], strides = [1, 1]} : vector<4x96xf32> to vector<4x32xf32>
    %100 = vector.extract_strided_slice %88 {offsets = [0, 64], sizes = [4, 32], strides = [1, 1]} : vector<4x96xf32> to vector<4x32xf32>
    %101 = arith.mulf %97, %100 : vector<4x32xf32>
    %102 = arith.addf %99, %101 : vector<4x32xf32>
    %103 = math.tanh %102 : vector<4x32xf32>
    %cst_21 = arith.constant 1.000000e+00 : f32
    %104 = vector.broadcast %cst_21 : f32 to vector<4x32xf32>
    %105 = arith.subf %104, %98 : vector<4x32xf32>
    %106 = arith.mulf %105, %103 : vector<4x32xf32>
    %107 = arith.mulf %98, %83 : vector<4x32xf32>
    %108 = arith.addf %106, %107 : vector<4x32xf32>
    %109 = vector.extract_strided_slice %5 {offsets = [16, 0], sizes = [4, 96], strides = [1, 1]} : vector<64x96xf32> to vector<4x96xf32>
    %110 = arith.truncf %108 : vector<4x32xf32> to vector<4x32xbf16>
    %cst_22 = arith.constant dense<0.000000e+00> : vector<4x96xf32>
    %111 = tpu.matmul %110, %6, %cst_22 {dimension_numbers = #tpu.dot_dimension_numbers<[1], [0], [0], [1], [0, 0, 1, 1], [], []>} : vector<4x32xbf16>, vector<32x96xbf16>, vector<4x96xf32> -> vector<4x96xf32>
    %112 = vector.broadcast %7 : vector<1x96xf32> to vector<4x96xf32>
    %113 = arith.addf %111, %112 : vector<4x96xf32>
    %114 = vector.extract_strided_slice %109 {offsets = [0, 0], sizes = [4, 64], strides = [1, 1]} : vector<4x96xf32> to vector<4x64xf32>
    %115 = vector.extract_strided_slice %113 {offsets = [0, 0], sizes = [4, 64], strides = [1, 1]} : vector<4x96xf32> to vector<4x64xf32>
    %116 = arith.addf %114, %115 : vector<4x64xf32>
    %117 = arith.negf %116 : vector<4x64xf32>
    %118 = math.exp %117 : vector<4x64xf32>
    %cst_23 = arith.constant 1.000000e+00 : f32
    %119 = vector.broadcast %cst_23 : f32 to vector<4x64xf32>
    %120 = arith.addf %119, %118 : vector<4x64xf32>
    %121 = arith.divf %119, %120 : vector<4x64xf32>
    %122 = vector.extract_strided_slice %121 {offsets = [0, 0], sizes = [4, 32], strides = [1, 1]} : vector<4x64xf32> to vector<4x32xf32>
    %123 = vector.extract_strided_slice %121 {offsets = [0, 32], sizes = [4, 32], strides = [1, 1]} : vector<4x64xf32> to vector<4x32xf32>
    %124 = vector.extract_strided_slice %109 {offsets = [0, 64], sizes = [4, 32], strides = [1, 1]} : vector<4x96xf32> to vector<4x32xf32>
    %125 = vector.extract_strided_slice %113 {offsets = [0, 64], sizes = [4, 32], strides = [1, 1]} : vector<4x96xf32> to vector<4x32xf32>
    %126 = arith.mulf %122, %125 : vector<4x32xf32>
    %127 = arith.addf %124, %126 : vector<4x32xf32>
    %128 = math.tanh %127 : vector<4x32xf32>
    %cst_24 = arith.constant 1.000000e+00 : f32
    %129 = vector.broadcast %cst_24 : f32 to vector<4x32xf32>
    %130 = arith.subf %129, %123 : vector<4x32xf32>
    %131 = arith.mulf %130, %128 : vector<4x32xf32>
    %132 = arith.mulf %123, %108 : vector<4x32xf32>
    %133 = arith.addf %131, %132 : vector<4x32xf32>
    %134 = vector.extract_strided_slice %5 {offsets = [20, 0], sizes = [4, 96], strides = [1, 1]} : vector<64x96xf32> to vector<4x96xf32>
    %135 = arith.truncf %133 : vector<4x32xf32> to vector<4x32xbf16>
    %cst_25 = arith.constant dense<0.000000e+00> : vector<4x96xf32>
    %136 = tpu.matmul %135, %6, %cst_25 {dimension_numbers = #tpu.dot_dimension_numbers<[1], [0], [0], [1], [0, 0, 1, 1], [], []>} : vector<4x32xbf16>, vector<32x96xbf16>, vector<4x96xf32> -> vector<4x96xf32>
    %137 = vector.broadcast %7 : vector<1x96xf32> to vector<4x96xf32>
    %138 = arith.addf %136, %137 : vector<4x96xf32>
    %139 = vector.extract_strided_slice %134 {offsets = [0, 0], sizes = [4, 64], strides = [1, 1]} : vector<4x96xf32> to vector<4x64xf32>
    %140 = vector.extract_strided_slice %138 {offsets = [0, 0], sizes = [4, 64], strides = [1, 1]} : vector<4x96xf32> to vector<4x64xf32>
    %141 = arith.addf %139, %140 : vector<4x64xf32>
    %142 = arith.negf %141 : vector<4x64xf32>
    %143 = math.exp %142 : vector<4x64xf32>
    %cst_26 = arith.constant 1.000000e+00 : f32
    %144 = vector.broadcast %cst_26 : f32 to vector<4x64xf32>
    %145 = arith.addf %144, %143 : vector<4x64xf32>
    %146 = arith.divf %144, %145 : vector<4x64xf32>
    %147 = vector.extract_strided_slice %146 {offsets = [0, 0], sizes = [4, 32], strides = [1, 1]} : vector<4x64xf32> to vector<4x32xf32>
    %148 = vector.extract_strided_slice %146 {offsets = [0, 32], sizes = [4, 32], strides = [1, 1]} : vector<4x64xf32> to vector<4x32xf32>
    %149 = vector.extract_strided_slice %134 {offsets = [0, 64], sizes = [4, 32], strides = [1, 1]} : vector<4x96xf32> to vector<4x32xf32>
    %150 = vector.extract_strided_slice %138 {offsets = [0, 64], sizes = [4, 32], strides = [1, 1]} : vector<4x96xf32> to vector<4x32xf32>
    %151 = arith.mulf %147, %150 : vector<4x32xf32>
    %152 = arith.addf %149, %151 : vector<4x32xf32>
    %153 = math.tanh %152 : vector<4x32xf32>
    %cst_27 = arith.constant 1.000000e+00 : f32
    %154 = vector.broadcast %cst_27 : f32 to vector<4x32xf32>
    %155 = arith.subf %154, %148 : vector<4x32xf32>
    %156 = arith.mulf %155, %153 : vector<4x32xf32>
    %157 = arith.mulf %148, %133 : vector<4x32xf32>
    %158 = arith.addf %156, %157 : vector<4x32xf32>
    %159 = vector.extract_strided_slice %5 {offsets = [24, 0], sizes = [4, 96], strides = [1, 1]} : vector<64x96xf32> to vector<4x96xf32>
    %160 = arith.truncf %158 : vector<4x32xf32> to vector<4x32xbf16>
    %cst_28 = arith.constant dense<0.000000e+00> : vector<4x96xf32>
    %161 = tpu.matmul %160, %6, %cst_28 {dimension_numbers = #tpu.dot_dimension_numbers<[1], [0], [0], [1], [0, 0, 1, 1], [], []>} : vector<4x32xbf16>, vector<32x96xbf16>, vector<4x96xf32> -> vector<4x96xf32>
    %162 = vector.broadcast %7 : vector<1x96xf32> to vector<4x96xf32>
    %163 = arith.addf %161, %162 : vector<4x96xf32>
    %164 = vector.extract_strided_slice %159 {offsets = [0, 0], sizes = [4, 64], strides = [1, 1]} : vector<4x96xf32> to vector<4x64xf32>
    %165 = vector.extract_strided_slice %163 {offsets = [0, 0], sizes = [4, 64], strides = [1, 1]} : vector<4x96xf32> to vector<4x64xf32>
    %166 = arith.addf %164, %165 : vector<4x64xf32>
    %167 = arith.negf %166 : vector<4x64xf32>
    %168 = math.exp %167 : vector<4x64xf32>
    %cst_29 = arith.constant 1.000000e+00 : f32
    %169 = vector.broadcast %cst_29 : f32 to vector<4x64xf32>
    %170 = arith.addf %169, %168 : vector<4x64xf32>
    %171 = arith.divf %169, %170 : vector<4x64xf32>
    %172 = vector.extract_strided_slice %171 {offsets = [0, 0], sizes = [4, 32], strides = [1, 1]} : vector<4x64xf32> to vector<4x32xf32>
    %173 = vector.extract_strided_slice %171 {offsets = [0, 32], sizes = [4, 32], strides = [1, 1]} : vector<4x64xf32> to vector<4x32xf32>
    %174 = vector.extract_strided_slice %159 {offsets = [0, 64], sizes = [4, 32], strides = [1, 1]} : vector<4x96xf32> to vector<4x32xf32>
    %175 = vector.extract_strided_slice %163 {offsets = [0, 64], sizes = [4, 32], strides = [1, 1]} : vector<4x96xf32> to vector<4x32xf32>
    %176 = arith.mulf %172, %175 : vector<4x32xf32>
    %177 = arith.addf %174, %176 : vector<4x32xf32>
    %178 = math.tanh %177 : vector<4x32xf32>
    %cst_30 = arith.constant 1.000000e+00 : f32
    %179 = vector.broadcast %cst_30 : f32 to vector<4x32xf32>
    %180 = arith.subf %179, %173 : vector<4x32xf32>
    %181 = arith.mulf %180, %178 : vector<4x32xf32>
    %182 = arith.mulf %173, %158 : vector<4x32xf32>
    %183 = arith.addf %181, %182 : vector<4x32xf32>
    %184 = vector.extract_strided_slice %5 {offsets = [28, 0], sizes = [4, 96], strides = [1, 1]} : vector<64x96xf32> to vector<4x96xf32>
    %185 = arith.truncf %183 : vector<4x32xf32> to vector<4x32xbf16>
    %cst_31 = arith.constant dense<0.000000e+00> : vector<4x96xf32>
    %186 = tpu.matmul %185, %6, %cst_31 {dimension_numbers = #tpu.dot_dimension_numbers<[1], [0], [0], [1], [0, 0, 1, 1], [], []>} : vector<4x32xbf16>, vector<32x96xbf16>, vector<4x96xf32> -> vector<4x96xf32>
    %187 = vector.broadcast %7 : vector<1x96xf32> to vector<4x96xf32>
    %188 = arith.addf %186, %187 : vector<4x96xf32>
    %189 = vector.extract_strided_slice %184 {offsets = [0, 0], sizes = [4, 64], strides = [1, 1]} : vector<4x96xf32> to vector<4x64xf32>
    %190 = vector.extract_strided_slice %188 {offsets = [0, 0], sizes = [4, 64], strides = [1, 1]} : vector<4x96xf32> to vector<4x64xf32>
    %191 = arith.addf %189, %190 : vector<4x64xf32>
    %192 = arith.negf %191 : vector<4x64xf32>
    %193 = math.exp %192 : vector<4x64xf32>
    %cst_32 = arith.constant 1.000000e+00 : f32
    %194 = vector.broadcast %cst_32 : f32 to vector<4x64xf32>
    %195 = arith.addf %194, %193 : vector<4x64xf32>
    %196 = arith.divf %194, %195 : vector<4x64xf32>
    %197 = vector.extract_strided_slice %196 {offsets = [0, 0], sizes = [4, 32], strides = [1, 1]} : vector<4x64xf32> to vector<4x32xf32>
    %198 = vector.extract_strided_slice %196 {offsets = [0, 32], sizes = [4, 32], strides = [1, 1]} : vector<4x64xf32> to vector<4x32xf32>
    %199 = vector.extract_strided_slice %184 {offsets = [0, 64], sizes = [4, 32], strides = [1, 1]} : vector<4x96xf32> to vector<4x32xf32>
    %200 = vector.extract_strided_slice %188 {offsets = [0, 64], sizes = [4, 32], strides = [1, 1]} : vector<4x96xf32> to vector<4x32xf32>
    %201 = arith.mulf %197, %200 : vector<4x32xf32>
    %202 = arith.addf %199, %201 : vector<4x32xf32>
    %203 = math.tanh %202 : vector<4x32xf32>
    %cst_33 = arith.constant 1.000000e+00 : f32
    %204 = vector.broadcast %cst_33 : f32 to vector<4x32xf32>
    %205 = arith.subf %204, %198 : vector<4x32xf32>
    %206 = arith.mulf %205, %203 : vector<4x32xf32>
    %207 = arith.mulf %198, %183 : vector<4x32xf32>
    %208 = arith.addf %206, %207 : vector<4x32xf32>
    %209 = vector.extract_strided_slice %5 {offsets = [32, 0], sizes = [4, 96], strides = [1, 1]} : vector<64x96xf32> to vector<4x96xf32>
    %210 = arith.truncf %208 : vector<4x32xf32> to vector<4x32xbf16>
    %cst_34 = arith.constant dense<0.000000e+00> : vector<4x96xf32>
    %211 = tpu.matmul %210, %6, %cst_34 {dimension_numbers = #tpu.dot_dimension_numbers<[1], [0], [0], [1], [0, 0, 1, 1], [], []>} : vector<4x32xbf16>, vector<32x96xbf16>, vector<4x96xf32> -> vector<4x96xf32>
    %212 = vector.broadcast %7 : vector<1x96xf32> to vector<4x96xf32>
    %213 = arith.addf %211, %212 : vector<4x96xf32>
    %214 = vector.extract_strided_slice %209 {offsets = [0, 0], sizes = [4, 64], strides = [1, 1]} : vector<4x96xf32> to vector<4x64xf32>
    %215 = vector.extract_strided_slice %213 {offsets = [0, 0], sizes = [4, 64], strides = [1, 1]} : vector<4x96xf32> to vector<4x64xf32>
    %216 = arith.addf %214, %215 : vector<4x64xf32>
    %217 = arith.negf %216 : vector<4x64xf32>
    %218 = math.exp %217 : vector<4x64xf32>
    %cst_35 = arith.constant 1.000000e+00 : f32
    %219 = vector.broadcast %cst_35 : f32 to vector<4x64xf32>
    %220 = arith.addf %219, %218 : vector<4x64xf32>
    %221 = arith.divf %219, %220 : vector<4x64xf32>
    %222 = vector.extract_strided_slice %221 {offsets = [0, 0], sizes = [4, 32], strides = [1, 1]} : vector<4x64xf32> to vector<4x32xf32>
    %223 = vector.extract_strided_slice %221 {offsets = [0, 32], sizes = [4, 32], strides = [1, 1]} : vector<4x64xf32> to vector<4x32xf32>
    %224 = vector.extract_strided_slice %209 {offsets = [0, 64], sizes = [4, 32], strides = [1, 1]} : vector<4x96xf32> to vector<4x32xf32>
    %225 = vector.extract_strided_slice %213 {offsets = [0, 64], sizes = [4, 32], strides = [1, 1]} : vector<4x96xf32> to vector<4x32xf32>
    %226 = arith.mulf %222, %225 : vector<4x32xf32>
    %227 = arith.addf %224, %226 : vector<4x32xf32>
    %228 = math.tanh %227 : vector<4x32xf32>
    %cst_36 = arith.constant 1.000000e+00 : f32
    %229 = vector.broadcast %cst_36 : f32 to vector<4x32xf32>
    %230 = arith.subf %229, %223 : vector<4x32xf32>
    %231 = arith.mulf %230, %228 : vector<4x32xf32>
    %232 = arith.mulf %223, %208 : vector<4x32xf32>
    %233 = arith.addf %231, %232 : vector<4x32xf32>
    %234 = vector.extract_strided_slice %5 {offsets = [36, 0], sizes = [4, 96], strides = [1, 1]} : vector<64x96xf32> to vector<4x96xf32>
    %235 = arith.truncf %233 : vector<4x32xf32> to vector<4x32xbf16>
    %cst_37 = arith.constant dense<0.000000e+00> : vector<4x96xf32>
    %236 = tpu.matmul %235, %6, %cst_37 {dimension_numbers = #tpu.dot_dimension_numbers<[1], [0], [0], [1], [0, 0, 1, 1], [], []>} : vector<4x32xbf16>, vector<32x96xbf16>, vector<4x96xf32> -> vector<4x96xf32>
    %237 = vector.broadcast %7 : vector<1x96xf32> to vector<4x96xf32>
    %238 = arith.addf %236, %237 : vector<4x96xf32>
    %239 = vector.extract_strided_slice %234 {offsets = [0, 0], sizes = [4, 64], strides = [1, 1]} : vector<4x96xf32> to vector<4x64xf32>
    %240 = vector.extract_strided_slice %238 {offsets = [0, 0], sizes = [4, 64], strides = [1, 1]} : vector<4x96xf32> to vector<4x64xf32>
    %241 = arith.addf %239, %240 : vector<4x64xf32>
    %242 = arith.negf %241 : vector<4x64xf32>
    %243 = math.exp %242 : vector<4x64xf32>
    %cst_38 = arith.constant 1.000000e+00 : f32
    %244 = vector.broadcast %cst_38 : f32 to vector<4x64xf32>
    %245 = arith.addf %244, %243 : vector<4x64xf32>
    %246 = arith.divf %244, %245 : vector<4x64xf32>
    %247 = vector.extract_strided_slice %246 {offsets = [0, 0], sizes = [4, 32], strides = [1, 1]} : vector<4x64xf32> to vector<4x32xf32>
    %248 = vector.extract_strided_slice %246 {offsets = [0, 32], sizes = [4, 32], strides = [1, 1]} : vector<4x64xf32> to vector<4x32xf32>
    %249 = vector.extract_strided_slice %234 {offsets = [0, 64], sizes = [4, 32], strides = [1, 1]} : vector<4x96xf32> to vector<4x32xf32>
    %250 = vector.extract_strided_slice %238 {offsets = [0, 64], sizes = [4, 32], strides = [1, 1]} : vector<4x96xf32> to vector<4x32xf32>
    %251 = arith.mulf %247, %250 : vector<4x32xf32>
    %252 = arith.addf %249, %251 : vector<4x32xf32>
    %253 = math.tanh %252 : vector<4x32xf32>
    %cst_39 = arith.constant 1.000000e+00 : f32
    %254 = vector.broadcast %cst_39 : f32 to vector<4x32xf32>
    %255 = arith.subf %254, %248 : vector<4x32xf32>
    %256 = arith.mulf %255, %253 : vector<4x32xf32>
    %257 = arith.mulf %248, %233 : vector<4x32xf32>
    %258 = arith.addf %256, %257 : vector<4x32xf32>
    %259 = vector.extract_strided_slice %5 {offsets = [40, 0], sizes = [4, 96], strides = [1, 1]} : vector<64x96xf32> to vector<4x96xf32>
    %260 = arith.truncf %258 : vector<4x32xf32> to vector<4x32xbf16>
    %cst_40 = arith.constant dense<0.000000e+00> : vector<4x96xf32>
    %261 = tpu.matmul %260, %6, %cst_40 {dimension_numbers = #tpu.dot_dimension_numbers<[1], [0], [0], [1], [0, 0, 1, 1], [], []>} : vector<4x32xbf16>, vector<32x96xbf16>, vector<4x96xf32> -> vector<4x96xf32>
    %262 = vector.broadcast %7 : vector<1x96xf32> to vector<4x96xf32>
    %263 = arith.addf %261, %262 : vector<4x96xf32>
    %264 = vector.extract_strided_slice %259 {offsets = [0, 0], sizes = [4, 64], strides = [1, 1]} : vector<4x96xf32> to vector<4x64xf32>
    %265 = vector.extract_strided_slice %263 {offsets = [0, 0], sizes = [4, 64], strides = [1, 1]} : vector<4x96xf32> to vector<4x64xf32>
    %266 = arith.addf %264, %265 : vector<4x64xf32>
    %267 = arith.negf %266 : vector<4x64xf32>
    %268 = math.exp %267 : vector<4x64xf32>
    %cst_41 = arith.constant 1.000000e+00 : f32
    %269 = vector.broadcast %cst_41 : f32 to vector<4x64xf32>
    %270 = arith.addf %269, %268 : vector<4x64xf32>
    %271 = arith.divf %269, %270 : vector<4x64xf32>
    %272 = vector.extract_strided_slice %271 {offsets = [0, 0], sizes = [4, 32], strides = [1, 1]} : vector<4x64xf32> to vector<4x32xf32>
    %273 = vector.extract_strided_slice %271 {offsets = [0, 32], sizes = [4, 32], strides = [1, 1]} : vector<4x64xf32> to vector<4x32xf32>
    %274 = vector.extract_strided_slice %259 {offsets = [0, 64], sizes = [4, 32], strides = [1, 1]} : vector<4x96xf32> to vector<4x32xf32>
    %275 = vector.extract_strided_slice %263 {offsets = [0, 64], sizes = [4, 32], strides = [1, 1]} : vector<4x96xf32> to vector<4x32xf32>
    %276 = arith.mulf %272, %275 : vector<4x32xf32>
    %277 = arith.addf %274, %276 : vector<4x32xf32>
    %278 = math.tanh %277 : vector<4x32xf32>
    %cst_42 = arith.constant 1.000000e+00 : f32
    %279 = vector.broadcast %cst_42 : f32 to vector<4x32xf32>
    %280 = arith.subf %279, %273 : vector<4x32xf32>
    %281 = arith.mulf %280, %278 : vector<4x32xf32>
    %282 = arith.mulf %273, %258 : vector<4x32xf32>
    %283 = arith.addf %281, %282 : vector<4x32xf32>
    %284 = vector.extract_strided_slice %5 {offsets = [44, 0], sizes = [4, 96], strides = [1, 1]} : vector<64x96xf32> to vector<4x96xf32>
    %285 = arith.truncf %283 : vector<4x32xf32> to vector<4x32xbf16>
    %cst_43 = arith.constant dense<0.000000e+00> : vector<4x96xf32>
    %286 = tpu.matmul %285, %6, %cst_43 {dimension_numbers = #tpu.dot_dimension_numbers<[1], [0], [0], [1], [0, 0, 1, 1], [], []>} : vector<4x32xbf16>, vector<32x96xbf16>, vector<4x96xf32> -> vector<4x96xf32>
    %287 = vector.broadcast %7 : vector<1x96xf32> to vector<4x96xf32>
    %288 = arith.addf %286, %287 : vector<4x96xf32>
    %289 = vector.extract_strided_slice %284 {offsets = [0, 0], sizes = [4, 64], strides = [1, 1]} : vector<4x96xf32> to vector<4x64xf32>
    %290 = vector.extract_strided_slice %288 {offsets = [0, 0], sizes = [4, 64], strides = [1, 1]} : vector<4x96xf32> to vector<4x64xf32>
    %291 = arith.addf %289, %290 : vector<4x64xf32>
    %292 = arith.negf %291 : vector<4x64xf32>
    %293 = math.exp %292 : vector<4x64xf32>
    %cst_44 = arith.constant 1.000000e+00 : f32
    %294 = vector.broadcast %cst_44 : f32 to vector<4x64xf32>
    %295 = arith.addf %294, %293 : vector<4x64xf32>
    %296 = arith.divf %294, %295 : vector<4x64xf32>
    %297 = vector.extract_strided_slice %296 {offsets = [0, 0], sizes = [4, 32], strides = [1, 1]} : vector<4x64xf32> to vector<4x32xf32>
    %298 = vector.extract_strided_slice %296 {offsets = [0, 32], sizes = [4, 32], strides = [1, 1]} : vector<4x64xf32> to vector<4x32xf32>
    %299 = vector.extract_strided_slice %284 {offsets = [0, 64], sizes = [4, 32], strides = [1, 1]} : vector<4x96xf32> to vector<4x32xf32>
    %300 = vector.extract_strided_slice %288 {offsets = [0, 64], sizes = [4, 32], strides = [1, 1]} : vector<4x96xf32> to vector<4x32xf32>
    %301 = arith.mulf %297, %300 : vector<4x32xf32>
    %302 = arith.addf %299, %301 : vector<4x32xf32>
    %303 = math.tanh %302 : vector<4x32xf32>
    %cst_45 = arith.constant 1.000000e+00 : f32
    %304 = vector.broadcast %cst_45 : f32 to vector<4x32xf32>
    %305 = arith.subf %304, %298 : vector<4x32xf32>
    %306 = arith.mulf %305, %303 : vector<4x32xf32>
    %307 = arith.mulf %298, %283 : vector<4x32xf32>
    %308 = arith.addf %306, %307 : vector<4x32xf32>
    %309 = vector.extract_strided_slice %5 {offsets = [48, 0], sizes = [4, 96], strides = [1, 1]} : vector<64x96xf32> to vector<4x96xf32>
    %310 = arith.truncf %308 : vector<4x32xf32> to vector<4x32xbf16>
    %cst_46 = arith.constant dense<0.000000e+00> : vector<4x96xf32>
    %311 = tpu.matmul %310, %6, %cst_46 {dimension_numbers = #tpu.dot_dimension_numbers<[1], [0], [0], [1], [0, 0, 1, 1], [], []>} : vector<4x32xbf16>, vector<32x96xbf16>, vector<4x96xf32> -> vector<4x96xf32>
    %312 = vector.broadcast %7 : vector<1x96xf32> to vector<4x96xf32>
    %313 = arith.addf %311, %312 : vector<4x96xf32>
    %314 = vector.extract_strided_slice %309 {offsets = [0, 0], sizes = [4, 64], strides = [1, 1]} : vector<4x96xf32> to vector<4x64xf32>
    %315 = vector.extract_strided_slice %313 {offsets = [0, 0], sizes = [4, 64], strides = [1, 1]} : vector<4x96xf32> to vector<4x64xf32>
    %316 = arith.addf %314, %315 : vector<4x64xf32>
    %317 = arith.negf %316 : vector<4x64xf32>
    %318 = math.exp %317 : vector<4x64xf32>
    %cst_47 = arith.constant 1.000000e+00 : f32
    %319 = vector.broadcast %cst_47 : f32 to vector<4x64xf32>
    %320 = arith.addf %319, %318 : vector<4x64xf32>
    %321 = arith.divf %319, %320 : vector<4x64xf32>
    %322 = vector.extract_strided_slice %321 {offsets = [0, 0], sizes = [4, 32], strides = [1, 1]} : vector<4x64xf32> to vector<4x32xf32>
    %323 = vector.extract_strided_slice %321 {offsets = [0, 32], sizes = [4, 32], strides = [1, 1]} : vector<4x64xf32> to vector<4x32xf32>
    %324 = vector.extract_strided_slice %309 {offsets = [0, 64], sizes = [4, 32], strides = [1, 1]} : vector<4x96xf32> to vector<4x32xf32>
    %325 = vector.extract_strided_slice %313 {offsets = [0, 64], sizes = [4, 32], strides = [1, 1]} : vector<4x96xf32> to vector<4x32xf32>
    %326 = arith.mulf %322, %325 : vector<4x32xf32>
    %327 = arith.addf %324, %326 : vector<4x32xf32>
    %328 = math.tanh %327 : vector<4x32xf32>
    %cst_48 = arith.constant 1.000000e+00 : f32
    %329 = vector.broadcast %cst_48 : f32 to vector<4x32xf32>
    %330 = arith.subf %329, %323 : vector<4x32xf32>
    %331 = arith.mulf %330, %328 : vector<4x32xf32>
    %332 = arith.mulf %323, %308 : vector<4x32xf32>
    %333 = arith.addf %331, %332 : vector<4x32xf32>
    %334 = vector.extract_strided_slice %5 {offsets = [52, 0], sizes = [4, 96], strides = [1, 1]} : vector<64x96xf32> to vector<4x96xf32>
    %335 = arith.truncf %333 : vector<4x32xf32> to vector<4x32xbf16>
    %cst_49 = arith.constant dense<0.000000e+00> : vector<4x96xf32>
    %336 = tpu.matmul %335, %6, %cst_49 {dimension_numbers = #tpu.dot_dimension_numbers<[1], [0], [0], [1], [0, 0, 1, 1], [], []>} : vector<4x32xbf16>, vector<32x96xbf16>, vector<4x96xf32> -> vector<4x96xf32>
    %337 = vector.broadcast %7 : vector<1x96xf32> to vector<4x96xf32>
    %338 = arith.addf %336, %337 : vector<4x96xf32>
    %339 = vector.extract_strided_slice %334 {offsets = [0, 0], sizes = [4, 64], strides = [1, 1]} : vector<4x96xf32> to vector<4x64xf32>
    %340 = vector.extract_strided_slice %338 {offsets = [0, 0], sizes = [4, 64], strides = [1, 1]} : vector<4x96xf32> to vector<4x64xf32>
    %341 = arith.addf %339, %340 : vector<4x64xf32>
    %342 = arith.negf %341 : vector<4x64xf32>
    %343 = math.exp %342 : vector<4x64xf32>
    %cst_50 = arith.constant 1.000000e+00 : f32
    %344 = vector.broadcast %cst_50 : f32 to vector<4x64xf32>
    %345 = arith.addf %344, %343 : vector<4x64xf32>
    %346 = arith.divf %344, %345 : vector<4x64xf32>
    %347 = vector.extract_strided_slice %346 {offsets = [0, 0], sizes = [4, 32], strides = [1, 1]} : vector<4x64xf32> to vector<4x32xf32>
    %348 = vector.extract_strided_slice %346 {offsets = [0, 32], sizes = [4, 32], strides = [1, 1]} : vector<4x64xf32> to vector<4x32xf32>
    %349 = vector.extract_strided_slice %334 {offsets = [0, 64], sizes = [4, 32], strides = [1, 1]} : vector<4x96xf32> to vector<4x32xf32>
    %350 = vector.extract_strided_slice %338 {offsets = [0, 64], sizes = [4, 32], strides = [1, 1]} : vector<4x96xf32> to vector<4x32xf32>
    %351 = arith.mulf %347, %350 : vector<4x32xf32>
    %352 = arith.addf %349, %351 : vector<4x32xf32>
    %353 = math.tanh %352 : vector<4x32xf32>
    %cst_51 = arith.constant 1.000000e+00 : f32
    %354 = vector.broadcast %cst_51 : f32 to vector<4x32xf32>
    %355 = arith.subf %354, %348 : vector<4x32xf32>
    %356 = arith.mulf %355, %353 : vector<4x32xf32>
    %357 = arith.mulf %348, %333 : vector<4x32xf32>
    %358 = arith.addf %356, %357 : vector<4x32xf32>
    %359 = vector.extract_strided_slice %5 {offsets = [56, 0], sizes = [4, 96], strides = [1, 1]} : vector<64x96xf32> to vector<4x96xf32>
    %360 = arith.truncf %358 : vector<4x32xf32> to vector<4x32xbf16>
    %cst_52 = arith.constant dense<0.000000e+00> : vector<4x96xf32>
    %361 = tpu.matmul %360, %6, %cst_52 {dimension_numbers = #tpu.dot_dimension_numbers<[1], [0], [0], [1], [0, 0, 1, 1], [], []>} : vector<4x32xbf16>, vector<32x96xbf16>, vector<4x96xf32> -> vector<4x96xf32>
    %362 = vector.broadcast %7 : vector<1x96xf32> to vector<4x96xf32>
    %363 = arith.addf %361, %362 : vector<4x96xf32>
    %364 = vector.extract_strided_slice %359 {offsets = [0, 0], sizes = [4, 64], strides = [1, 1]} : vector<4x96xf32> to vector<4x64xf32>
    %365 = vector.extract_strided_slice %363 {offsets = [0, 0], sizes = [4, 64], strides = [1, 1]} : vector<4x96xf32> to vector<4x64xf32>
    %366 = arith.addf %364, %365 : vector<4x64xf32>
    %367 = arith.negf %366 : vector<4x64xf32>
    %368 = math.exp %367 : vector<4x64xf32>
    %cst_53 = arith.constant 1.000000e+00 : f32
    %369 = vector.broadcast %cst_53 : f32 to vector<4x64xf32>
    %370 = arith.addf %369, %368 : vector<4x64xf32>
    %371 = arith.divf %369, %370 : vector<4x64xf32>
    %372 = vector.extract_strided_slice %371 {offsets = [0, 0], sizes = [4, 32], strides = [1, 1]} : vector<4x64xf32> to vector<4x32xf32>
    %373 = vector.extract_strided_slice %371 {offsets = [0, 32], sizes = [4, 32], strides = [1, 1]} : vector<4x64xf32> to vector<4x32xf32>
    %374 = vector.extract_strided_slice %359 {offsets = [0, 64], sizes = [4, 32], strides = [1, 1]} : vector<4x96xf32> to vector<4x32xf32>
    %375 = vector.extract_strided_slice %363 {offsets = [0, 64], sizes = [4, 32], strides = [1, 1]} : vector<4x96xf32> to vector<4x32xf32>
    %376 = arith.mulf %372, %375 : vector<4x32xf32>
    %377 = arith.addf %374, %376 : vector<4x32xf32>
    %378 = math.tanh %377 : vector<4x32xf32>
    %cst_54 = arith.constant 1.000000e+00 : f32
    %379 = vector.broadcast %cst_54 : f32 to vector<4x32xf32>
    %380 = arith.subf %379, %373 : vector<4x32xf32>
    %381 = arith.mulf %380, %378 : vector<4x32xf32>
    %382 = arith.mulf %373, %358 : vector<4x32xf32>
    %383 = arith.addf %381, %382 : vector<4x32xf32>
    %384 = vector.extract_strided_slice %5 {offsets = [60, 0], sizes = [4, 96], strides = [1, 1]} : vector<64x96xf32> to vector<4x96xf32>
    %385 = arith.truncf %383 : vector<4x32xf32> to vector<4x32xbf16>
    %cst_55 = arith.constant dense<0.000000e+00> : vector<4x96xf32>
    %386 = tpu.matmul %385, %6, %cst_55 {dimension_numbers = #tpu.dot_dimension_numbers<[1], [0], [0], [1], [0, 0, 1, 1], [], []>} : vector<4x32xbf16>, vector<32x96xbf16>, vector<4x96xf32> -> vector<4x96xf32>
    %387 = vector.broadcast %7 : vector<1x96xf32> to vector<4x96xf32>
    %388 = arith.addf %386, %387 : vector<4x96xf32>
    %389 = vector.extract_strided_slice %384 {offsets = [0, 0], sizes = [4, 64], strides = [1, 1]} : vector<4x96xf32> to vector<4x64xf32>
    %390 = vector.extract_strided_slice %388 {offsets = [0, 0], sizes = [4, 64], strides = [1, 1]} : vector<4x96xf32> to vector<4x64xf32>
    %391 = arith.addf %389, %390 : vector<4x64xf32>
    %392 = arith.negf %391 : vector<4x64xf32>
    %393 = math.exp %392 : vector<4x64xf32>
    %cst_56 = arith.constant 1.000000e+00 : f32
    %394 = vector.broadcast %cst_56 : f32 to vector<4x64xf32>
    %395 = arith.addf %394, %393 : vector<4x64xf32>
    %396 = arith.divf %394, %395 : vector<4x64xf32>
    %397 = vector.extract_strided_slice %396 {offsets = [0, 0], sizes = [4, 32], strides = [1, 1]} : vector<4x64xf32> to vector<4x32xf32>
    %398 = vector.extract_strided_slice %396 {offsets = [0, 32], sizes = [4, 32], strides = [1, 1]} : vector<4x64xf32> to vector<4x32xf32>
    %399 = vector.extract_strided_slice %384 {offsets = [0, 64], sizes = [4, 32], strides = [1, 1]} : vector<4x96xf32> to vector<4x32xf32>
    %400 = vector.extract_strided_slice %388 {offsets = [0, 64], sizes = [4, 32], strides = [1, 1]} : vector<4x96xf32> to vector<4x32xf32>
    %401 = arith.mulf %397, %400 : vector<4x32xf32>
    %402 = arith.addf %399, %401 : vector<4x32xf32>
    %403 = math.tanh %402 : vector<4x32xf32>
    %cst_57 = arith.constant 1.000000e+00 : f32
    %404 = vector.broadcast %cst_57 : f32 to vector<4x32xf32>
    %405 = arith.subf %404, %398 : vector<4x32xf32>
    %406 = arith.mulf %405, %403 : vector<4x32xf32>
    %407 = arith.mulf %398, %383 : vector<4x32xf32>
    %408 = arith.addf %406, %407 : vector<4x32xf32>
    %409 = vector.shape_cast %33 : vector<4x32xf32> to vector<1x4x32xf32>
    %410 = vector.shape_cast %58 : vector<4x32xf32> to vector<1x4x32xf32>
    %411 = vector.shape_cast %83 : vector<4x32xf32> to vector<1x4x32xf32>
    %412 = vector.shape_cast %108 : vector<4x32xf32> to vector<1x4x32xf32>
    %413 = vector.shape_cast %133 : vector<4x32xf32> to vector<1x4x32xf32>
    %414 = vector.shape_cast %158 : vector<4x32xf32> to vector<1x4x32xf32>
    %415 = vector.shape_cast %183 : vector<4x32xf32> to vector<1x4x32xf32>
    %416 = vector.shape_cast %208 : vector<4x32xf32> to vector<1x4x32xf32>
    %417 = vector.shape_cast %233 : vector<4x32xf32> to vector<1x4x32xf32>
    %418 = vector.shape_cast %258 : vector<4x32xf32> to vector<1x4x32xf32>
    %419 = vector.shape_cast %283 : vector<4x32xf32> to vector<1x4x32xf32>
    %420 = vector.shape_cast %308 : vector<4x32xf32> to vector<1x4x32xf32>
    %421 = vector.shape_cast %333 : vector<4x32xf32> to vector<1x4x32xf32>
    %422 = vector.shape_cast %358 : vector<4x32xf32> to vector<1x4x32xf32>
    %423 = vector.shape_cast %383 : vector<4x32xf32> to vector<1x4x32xf32>
    %424 = vector.shape_cast %408 : vector<4x32xf32> to vector<1x4x32xf32>
    %425 = tpu.concatenate %409, %410, %411, %412, %413, %414, %415, %416, %417, %418, %419, %420, %421, %422, %423, %424 in 0 : vector<1x4x32xf32>, vector<1x4x32xf32>, vector<1x4x32xf32>, vector<1x4x32xf32>, vector<1x4x32xf32>, vector<1x4x32xf32>, vector<1x4x32xf32>, vector<1x4x32xf32>, vector<1x4x32xf32>, vector<1x4x32xf32>, vector<1x4x32xf32>, vector<1x4x32xf32>, vector<1x4x32xf32>, vector<1x4x32xf32>, vector<1x4x32xf32>, vector<1x4x32xf32> -> vector<16x4x32xf32>
    %426 = vector.shape_cast %408 : vector<4x32xf32> to vector<1x4x32xf32>
    %427 = vector.shape_cast %383 : vector<4x32xf32> to vector<1x4x32xf32>
    %428 = vector.shape_cast %358 : vector<4x32xf32> to vector<1x4x32xf32>
    %429 = vector.shape_cast %333 : vector<4x32xf32> to vector<1x4x32xf32>
    %430 = vector.shape_cast %308 : vector<4x32xf32> to vector<1x4x32xf32>
    %431 = vector.shape_cast %283 : vector<4x32xf32> to vector<1x4x32xf32>
    %432 = vector.shape_cast %258 : vector<4x32xf32> to vector<1x4x32xf32>
    %433 = vector.shape_cast %233 : vector<4x32xf32> to vector<1x4x32xf32>
    %434 = vector.shape_cast %208 : vector<4x32xf32> to vector<1x4x32xf32>
    %435 = vector.shape_cast %183 : vector<4x32xf32> to vector<1x4x32xf32>
    %436 = vector.shape_cast %158 : vector<4x32xf32> to vector<1x4x32xf32>
    %437 = vector.shape_cast %133 : vector<4x32xf32> to vector<1x4x32xf32>
    %438 = vector.shape_cast %108 : vector<4x32xf32> to vector<1x4x32xf32>
    %439 = vector.shape_cast %83 : vector<4x32xf32> to vector<1x4x32xf32>
    %440 = vector.shape_cast %58 : vector<4x32xf32> to vector<1x4x32xf32>
    %441 = vector.shape_cast %33 : vector<4x32xf32> to vector<1x4x32xf32>
    %442 = tpu.concatenate %426, %427, %428, %429, %430, %431, %432, %433, %434, %435, %436, %437, %438, %439, %440, %441 in 0 : vector<1x4x32xf32>, vector<1x4x32xf32>, vector<1x4x32xf32>, vector<1x4x32xf32>, vector<1x4x32xf32>, vector<1x4x32xf32>, vector<1x4x32xf32>, vector<1x4x32xf32>, vector<1x4x32xf32>, vector<1x4x32xf32>, vector<1x4x32xf32>, vector<1x4x32xf32>, vector<1x4x32xf32>, vector<1x4x32xf32>, vector<1x4x32xf32>, vector<1x4x32xf32> -> vector<16x4x32xf32>
    %443 = tpu.iota {dimensions = array<i32: 2>} : vector<1x1x32xi32>
    %c16_i32 = arith.constant 16 : i32
    %444 = vector.broadcast %c16_i32 : i32 to vector<1x1x32xi32>
    %445 = arith.cmpi slt, %443, %444 : vector<1x1x32xi32>
    %446 = vector.shape_cast %445 : vector<1x1x32xi1> to vector<1x1x32xi1>
    %447 = vector.broadcast %446 : vector<1x1x32xi1> to vector<16x4x32xi1>
    %448 = arith.select %447, %425, %442 : vector<16x4x32xi1>, vector<16x4x32xf32>
    %449 = vector.extract_strided_slice %448 {offsets = [0, 0, 0], sizes = [16, 1, 32], strides = [1, 1, 1]} : vector<16x4x32xf32> to vector<16x1x32xf32>
    %450 = vector.shape_cast %449 : vector<16x1x32xf32> to vector<16x32xf32>
    %451 = vector.extract_strided_slice %448 {offsets = [0, 1, 0], sizes = [16, 1, 32], strides = [1, 1, 1]} : vector<16x4x32xf32> to vector<16x1x32xf32>
    %452 = vector.shape_cast %451 : vector<16x1x32xf32> to vector<16x32xf32>
    %453 = vector.extract_strided_slice %448 {offsets = [0, 2, 0], sizes = [16, 1, 32], strides = [1, 1, 1]} : vector<16x4x32xf32> to vector<16x1x32xf32>
    %454 = vector.shape_cast %453 : vector<16x1x32xf32> to vector<16x32xf32>
    %455 = vector.extract_strided_slice %448 {offsets = [0, 3, 0], sizes = [16, 1, 32], strides = [1, 1, 1]} : vector<16x4x32xf32> to vector<16x1x32xf32>
    %456 = vector.shape_cast %455 : vector<16x1x32xf32> to vector<16x32xf32>
    %457 = tpu.concatenate %450, %452, %454, %456 in 1 : vector<16x32xf32>, vector<16x32xf32>, vector<16x32xf32>, vector<16x32xf32> -> vector<16x128xf32>
    %458 = arith.truncf %457 : vector<16x128xf32> to vector<16x128xbf16>
    %c0_58 = arith.constant 0 : index
    %c0_59 = arith.constant 0 : index
    %459 = vector.load %arg6[%c0_58, %c0_59] : memref<24x16xbf16, #tpu.memory_space<vmem>>, vector<24x16xbf16>
    %cst_60 = arith.constant dense<0.000000e+00> : vector<24x128xf32>
    %460 = tpu.matmul %459, %458, %cst_60 {dimension_numbers = #tpu.dot_dimension_numbers<[1], [0], [0], [1], [0, 0, 1, 1], [], []>} : vector<24x16xbf16>, vector<16x128xbf16>, vector<24x128xf32> -> vector<24x128xf32>
    %461 = vector.extract_strided_slice %460 {offsets = [0, 0], sizes = [8, 128], strides = [1, 1]} : vector<24x128xf32> to vector<8x128xf32>
    %462 = vector.extract_strided_slice %460 {offsets = [8, 0], sizes = [8, 128], strides = [1, 1]} : vector<24x128xf32> to vector<8x128xf32>
    %463 = vector.extract_strided_slice %462 {offsets = [0, 1], sizes = [8, 127], strides = [1, 1]} : vector<8x128xf32> to vector<8x127xf32>
    %464 = vector.extract_strided_slice %462 {offsets = [0, 0], sizes = [8, 1], strides = [1, 1]} : vector<8x128xf32> to vector<8x1xf32>
    %465 = tpu.concatenate %463, %464 in 1 : vector<8x127xf32>, vector<8x1xf32> -> vector<8x128xf32>
    %466 = arith.addf %461, %465 : vector<8x128xf32>
    %467 = vector.extract_strided_slice %460 {offsets = [16, 0], sizes = [8, 128], strides = [1, 1]} : vector<24x128xf32> to vector<8x128xf32>
    %468 = vector.extract_strided_slice %467 {offsets = [0, 2], sizes = [8, 126], strides = [1, 1]} : vector<8x128xf32> to vector<8x126xf32>
    %469 = vector.extract_strided_slice %467 {offsets = [0, 0], sizes = [8, 2], strides = [1, 1]} : vector<8x128xf32> to vector<8x2xf32>
    %470 = tpu.concatenate %468, %469 in 1 : vector<8x126xf32>, vector<8x2xf32> -> vector<8x128xf32>
    %471 = arith.addf %466, %470 : vector<8x128xf32>
    %c0_61 = arith.constant 0 : index
    %c0_62 = arith.constant 0 : index
    %472 = vector.load %arg7[%c0_61, %c0_62] : memref<8x1xf32, #tpu.memory_space<vmem>>, vector<8x1xf32>
    %473 = vector.broadcast %472 : vector<8x1xf32> to vector<8x128xf32>
    %474 = arith.addf %471, %473 : vector<8x128xf32>
    %cst_63 = arith.constant dense<0xFF800000> : vector<128xf32>
    %475 = vector.multi_reduction <maximumf>, %474, %cst_63 [0] : vector<8x128xf32> to vector<128xf32>
    %476 = vector.shape_cast %475 : vector<128xf32> to vector<1x128xf32>
    %477 = vector.extract_strided_slice %476 {offsets = [0, 0], sizes = [1, 30], strides = [1, 1]} : vector<1x128xf32> to vector<1x30xf32>
    %478 = vector.extract_strided_slice %476 {offsets = [0, 32], sizes = [1, 30], strides = [1, 1]} : vector<1x128xf32> to vector<1x30xf32>
    %479 = vector.extract_strided_slice %476 {offsets = [0, 64], sizes = [1, 30], strides = [1, 1]} : vector<1x128xf32> to vector<1x30xf32>
    %480 = vector.extract_strided_slice %476 {offsets = [0, 96], sizes = [1, 30], strides = [1, 1]} : vector<1x128xf32> to vector<1x30xf32>
    %481 = tpu.concatenate %477, %478, %479, %480 in 0 : vector<1x30xf32>, vector<1x30xf32>, vector<1x30xf32>, vector<1x30xf32> -> vector<4x30xf32>
    %c0_64 = arith.constant 0 : index
    %c0_65 = arith.constant 0 : index
    %482 = vector.load %arg1[%c0_64, %c0_65] : memref<4x1xf32, #tpu.memory_space<vmem>>, vector<4x1xf32>
    %483 = tpu.concatenate %481, %482 in 1 : vector<4x30xf32>, vector<4x1xf32> -> vector<4x31xf32>
    %484 = arith.truncf %483 : vector<4x31xf32> to vector<4x31xbf16>
    %c0_66 = arith.constant 0 : index
    %c0_67 = arith.constant 0 : index
    %485 = vector.load %arg8[%c0_66, %c0_67] : memref<31x32xbf16, #tpu.memory_space<vmem>>, vector<31x32xbf16>
    %cst_68 = arith.constant dense<0.000000e+00> : vector<4x32xf32>
    %486 = tpu.matmul %484, %485, %cst_68 {dimension_numbers = #tpu.dot_dimension_numbers<[1], [0], [0], [1], [0, 0, 1, 1], [], []>} : vector<4x31xbf16>, vector<31x32xbf16>, vector<4x32xf32> -> vector<4x32xf32>
    %c0_69 = arith.constant 0 : index
    %c0_70 = arith.constant 0 : index
    %487 = vector.load %arg9[%c0_69, %c0_70] : memref<1x32xf32, #tpu.memory_space<vmem>>, vector<1x32xf32>
    %488 = vector.broadcast %487 : vector<1x32xf32> to vector<4x32xf32>
    %489 = arith.addf %486, %488 : vector<4x32xf32>
    %c0_71 = arith.constant 0 : index
    %c0_72 = arith.constant 0 : index
    %490 = vector.load %arg10[%c0_71, %c0_72] : memref<1x1xf32, #tpu.memory_space<vmem>>, vector<1x1xf32>
    %cst_73 = arith.constant 0.000000e+00 : f32
    %491 = vector.broadcast %cst_73 : f32 to vector<4x32xf32>
    %492 = arith.cmpf oge, %489, %491 : vector<4x32xf32>
    %493 = vector.broadcast %490 : vector<1x1xf32> to vector<4x32xf32>
    %494 = arith.mulf %493, %489 : vector<4x32xf32>
    %495 = arith.select %492, %489, %494 : vector<4x32xi1>, vector<4x32xf32>
    %c0_74 = arith.constant 0 : index
    %c0_75 = arith.constant 0 : index
    %496 = vector.load %arg13[%c0_74, %c0_75] : memref<1x32xf32, #tpu.memory_space<vmem>>, vector<1x32xf32>
    %497 = vector.broadcast %496 : vector<1x32xf32> to vector<4x32xf32>
    %498 = arith.subf %495, %497 : vector<4x32xf32>
    %c0_76 = arith.constant 0 : index
    %c0_77 = arith.constant 0 : index
    %499 = vector.load %arg11[%c0_76, %c0_77] : memref<1x32xf32, #tpu.memory_space<vmem>>, vector<1x32xf32>
    %c0_78 = arith.constant 0 : index
    %c0_79 = arith.constant 0 : index
    %500 = vector.load %arg14[%c0_78, %c0_79] : memref<1x32xf32, #tpu.memory_space<vmem>>, vector<1x32xf32>
    %cst_80 = arith.constant 9.99999974E-6 : f32
    %501 = vector.broadcast %cst_80 : f32 to vector<1x32xf32>
    %502 = arith.addf %500, %501 : vector<1x32xf32>
    %503 = math.rsqrt %502 : vector<1x32xf32>
    %504 = arith.mulf %499, %503 : vector<1x32xf32>
    %505 = vector.broadcast %504 : vector<1x32xf32> to vector<4x32xf32>
    %506 = arith.mulf %498, %505 : vector<4x32xf32>
    %c0_81 = arith.constant 0 : index
    %c0_82 = arith.constant 0 : index
    %507 = vector.load %arg12[%c0_81, %c0_82] : memref<1x32xf32, #tpu.memory_space<vmem>>, vector<1x32xf32>
    %508 = vector.broadcast %507 : vector<1x32xf32> to vector<4x32xf32>
    %509 = arith.addf %506, %508 : vector<4x32xf32>
    %510 = arith.truncf %509 : vector<4x32xf32> to vector<4x32xbf16>
    %c0_83 = arith.constant 0 : index
    %c0_84 = arith.constant 0 : index
    %511 = vector.load %arg15[%c0_83, %c0_84] : memref<32x1xbf16, #tpu.memory_space<vmem>>, vector<32x1xbf16>
    %cst_85 = arith.constant dense<0.000000e+00> : vector<4x1xf32>
    %512 = tpu.matmul %510, %511, %cst_85 {dimension_numbers = #tpu.dot_dimension_numbers<[1], [0], [0], [1], [0, 0, 1, 1], [], []>} : vector<4x32xbf16>, vector<32x1xbf16>, vector<4x1xf32> -> vector<4x1xf32>
    %c0_86 = arith.constant 0 : index
    %c0_87 = arith.constant 0 : index
    %513 = vector.load %arg16[%c0_86, %c0_87] : memref<1x1xf32, #tpu.memory_space<vmem>>, vector<1x1xf32>
    %514 = vector.broadcast %513 : vector<1x1xf32> to vector<4x1xf32>
    %515 = arith.addf %512, %514 : vector<4x1xf32>
    %516 = arith.negf %515 : vector<4x1xf32>
    %517 = math.exp %516 : vector<4x1xf32>
    %cst_88 = arith.constant 1.000000e+00 : f32
    %518 = vector.broadcast %cst_88 : f32 to vector<4x1xf32>
    %519 = arith.addf %518, %517 : vector<4x1xf32>
    %520 = arith.divf %518, %519 : vector<4x1xf32>
    %c0_89 = arith.constant 0 : index
    %c0_90 = arith.constant 0 : index
    %521 = vector.load %arg17[%c0_89, %c0_90] : memref<4x1xf32, #tpu.memory_space<vmem>>, vector<4x1xf32>
    tpu.vector_store %arg17[%c0_89, %c0_90], %520 {strides = array<i32>} : memref<4x1xf32, #tpu.memory_space<vmem>>, vector<4x1xf32>,
    return
  }
}

</mosaic_0001>

<bundles_post_ra>
// kernel: neural_net_features_conv.1
= control target key start
LH: loop header
LB: loop body
LE: loop exit
PB: predicated region body
PF: predicated region fallthrough
CT: control target
= control target key end

     0   :  { %v3373_v0 = vmov 0.0   ;;  %vm2537_vm0 = vmmov 0   ;;  %v2538_v3 = vmov 0   ;;  %vm128_vm1 = vcmask 523264   ;;  %s2540_s19 = smov 96   ;;  %s2541_s30 = smov 32   ;;  %s3352_s2 = inlined_call_operand.vmem [shape: bf16[64,96], index: 2, kind: input, shape index: {}]   ;;  %s3353_s4 = inlined_call_operand.vmem [shape: bf16[32,96], index: 4, kind: input, shape index: {}]   ;;  %s3354_s0 = inlined_call_operand.vmem [shape: bf16[64,64], index: 0, kind: input, shape index: {}]   ;;  %s3355_s5 = inlined_call_operand.vmem [shape: f32[1,96], index: 5, kind: input, shape index: {}]   ;;  %s3356_s3 = inlined_call_operand.vmem [shape: f32[1,96], index: 3, kind: input, shape index: {}]   ;;  %s3357_s6 = inlined_call_operand.vmem [shape: bf16[24,16], index: 6, kind: input, shape index: {}]   ;;  %s3358_s7 = inlined_call_operand.vmem [shape: f32[8,1], index: 7, kind: input, shape index: {}]   ;;  %s3359_s10 = inlined_call_operand.<no memory space> [shape: f32[1,1], index: 10, kind: input, shape index: {}]   ;;  %s3360_s8 = inlined_call_operand.vmem [shape: bf16[31,32], index: 8, kind: input, shape index: {}]   ;;  %s3361_s1 = inlined_call_operand.vmem [shape: f32[4,1], index: 1, kind: input, shape index: {}]   ;;  %s3362_s15 = inlined_call_operand.vmem [shape: bf16[32,1], index: 15, kind: input, shape index: {}]   ;;  %s3363_s16 = inlined_call_operand.<no memory space> [shape: f32[1,1], index: 16, kind: input, shape index: {}]   ;;  %s3364_s14 = inlined_call_operand.vmem [shape: f32[1,32], index: 14, kind: input, shape index: {}]   ;;  %s3365_s11 = inlined_call_operand.vmem [shape: f32[1,32], index: 11, kind: input, shape index: {}]   ;;  %s3366_s9 = inlined_call_operand.vmem [shape: f32[1,32], index: 9, kind: input, shape index: {}]   ;;  %s3367_s13 = inlined_call_operand.vmem [shape: f32[1,32], index: 13, kind: input, shape index: {}]   ;;  %s3368_s12 = inlined_call_operand.vmem [shape: f32[1,32], index: 12, kind: input, shape index: {}]   ;;  %s3369_s17 = inlined_call_operand.vmem [shape: f32[4,1], index: 17, kind: output, shape index: {}]  }
   0x1   :  { %3375 = sst [smem:[#allocation4_spill]] %s3352_s2  ;;  %2178 = vmatprep.subr.bf16.mxu1 %v3373_v0  ;;  %2182 = vmatprep.mubr.msk.bf16.mxu1 %vm2537_vm0, %v3373_v0  ;;  %v2420_v7 = vld [vmem:[%s3354_s0] sm:$0xff]   ;;  %v2421_v9 = vld [vmem:[%s3354_s0 + $0x8] sm:$0xff]   ;;  %s2539_s2 = smov 64   ;;  %vm229_vm2 = vcmask 261120   ;;  %vm1582_vm4 = vcmask 1041409  }
   0x2   :  { %3376 = sst [smem:[#allocation5_spill]] %s3353_s4  ;;  %s3377_s26 = sld [smem:[#allocation4_spill]]  ;;  %2413 = vset.pattern.permute.xlu0 %v2538_v3  ;;  %2170 = vmatprep.mubr.msk.bf16.mxu0 %vm128_vm1, %v2420_v7  ;;  %v2687_v10 = vld [vmem:[%s3355_s5] ss:$0 sm:$0xff]  ;;  %vm1585_vm5 = vcmask 1042434   ;;  %vm1588_vm6 = vcmask 1043459  }
   0x3   :  { %s3378_s29 = sld [smem:[#allocation5_spill]]  ;;  %v2700_v20 = vld [vmem:[%s3356_s3] ss:$0 sm:$0xff]  ;;  %vm1594_vm7 = vcmask 1045509   ;;  %vm1591_vm8 = vcmask 1044484   ;;  %vm1597_vm9 = vcmask 1046534  }
   0x4   :  { %vm1600_vm10 = vcmask 1047559   ;;  %vm1739_vm11 = vcmask 130048   ;;  %vm1724_vm12 = vcmask 785408   ;;  %s2542_s21 = smov 127   ;;  %s2543_s22 = smov 126   ;;  %vm1867_vm13 = vcmask 1046528  }
   0x5   :  { %vm1868_vm14 = vcmask 1047552   ;;  %vm1827_vm15 = vcmask 1040384  }
   0x8   :  { %v2414_v1 = vld [vmem:[%s3377_s26] sm:$0xff]   ;;  %v2416_v4 = vld [vmem:[%s3377_s26 + $0x8] sm:$0xff]   ;;  %v2418_v6 = vld [vmem:[%s3377_s26 + $0x10] sm:$0xff]  }
   0x9   :  { %v2645_v2 = vld [vmem:[%s3378_s29] sm:$0xff]   ;;  %2162 = vmatprep.subr.bf16.mxu0 %v2414_v1  ;;  %v2654_v5 = vld [vmem:[%s3378_s29 + $0x8] sm:$0xff]   ;;  %v2419_v8 = vld [vmem:[%s3377_s26 + $0x18] sm:$0xff]  }
   0xa   :  { %2179 = vmatpush3.bf16.msra.mxu1 %v2645_v2  ;;  %2163 = vmatpush3.bf16.msra.mxu0 %v2414_v1 }
   0xb   :  { %2180 = vmatprep.subr.bf16.mxu1 %v3373_v0  ;;  %2164 = vmatprep.subr.bf16.mxu0 %v2416_v4 }
   0xe   :  { %2181 = vmatpush3.bf16.msra.mxu1 %v2654_v5  ;;  %2165 = vmatpush3.bf16.msra.mxu0 %v2416_v4 }
   0xf   :  { %2166 = vmatprep.subr.bf16.mxu0 %v2418_v6  ;;  %2186 = vmatprep.subr.bf16.mxu1 %v3373_v0 }
  0x11   :  { %2183 = vmatmul.mubr.bf16.vlgmr.msra.gmra.mrb[0].mxu1 %v2538_v3 }
  0x12   :  { %2167 = vmatpush3.bf16.msra.mxu0 %v2418_v6  ;;  %2187 = vmatpush3.bf16.msra.mxu1 %v2645_v2 }
  0x13   :  { %2168 = vmatprep.subr.bf16.mxu0 %v2419_v8  ;;  %2188 = vmatprep.subr.bf16.mxu1 %v3373_v0 }
  0x14   :  { %2190 = vmatprep.mubr.msk.bf16.mxu1 %vm2537_vm0, %v3373_v0 }
  0x16   :  { %2169 = vmatpush3.bf16.msra.mxu0 %v2419_v8  ;;  %2189 = vmatpush3.bf16.msra.mxu1 %v2654_v5 }
  0x17   :  { %2194 = vmatprep.subr.bf16.mxu1 %v3373_v0  ;;  %2202 = vmatprep.subr.bf16.mxu0 %v3373_v0 }
  0x19   :  { %2171 = vmatmul.mubr.msk.bf16.vlgmr.msra.gmra.mrb[0].mxu0 %vm128_vm1, %v2421_v9 }
  0x1a   :  { %2203 = vmatpush3.bf16.msra.mxu0 %v2645_v2 }
  0x1b   :  { %2204 = vmatprep.subr.bf16.mxu0 %v3373_v0 }
  0x1e   :  { %2205 = vmatpush3.bf16.msra.mxu0 %v2654_v5 }
  0x1f   :  { %2218 = vmatprep.subr.bf16.mxu0 %v3373_v0 }
  0xe4   :  { %v267_v11 = vpop.f32.mrb[0].mxu1 }
  0xe5   :  { %v268_v12 = vadd.f32 %v2687_v10, %v267_v11  ;;  %v2184_v13 = vpop.f32.mrb[1].mxu1 }
  0xe6   :  { %v270_v14 = vpop.f32.mrb[2].mxu1 }
  0xe7   :  { %281 = vrot.lane.b32.xlu0 %v268_v12, %s2539_s2  ;;  %v2185_v15 = vpop.f32.mrb[3].mxu1 }
  0xec   :  { %v2691_v16 = vpop.f32.mrb[0].mxu0 }
  0xed   :  { %v175_v17 = vpop.f32.mrb[1].mxu0 }
  0xee   :  { %v2693_v18 = vpop.f32.mrb[2].mxu0  ;;  %v176_v21 = vadd.f32 %v2700_v20, %v175_v17 }
  0xef   :  { %v2695_v19 = vpop.f32.mrb[3].mxu0 }
  0xf0   :  { %v273_v22 = vadd.f32 %v268_v12, %v176_v21  ;;  %v179_v8 = vadd.f32 %v2700_v20, %v2695_v19  ;;  %v2423_v19 = vld [vmem:[%s3354_s0 + $0x18] sm:$0xff]  }
  0xf2   :  { %v2050_v23 = vmul.f32 -1.442695, %v273_v22 }
  0xf4   :  { %2430 = vpow2.f32 %v2050_v23  ;;  %v2422_v23 = vld [vmem:[%s3354_s0 + $0x10] sm:$0xff]  }
  0xf5   :  { %2174 = vmatprep.mubr.msk.bf16.mxu0 %vm128_vm1, %v2422_v23 }
  0xf6   :  { %2175 = vmatmul.mubr.msk.bf16.gmra.mrb[4].mxu0 %vm128_vm1, %v2423_v19 }
  0xf7   :  { %2206 = vmatprep.mubr.msk.bf16.mxu0 %vm2537_vm0, %v3373_v0 }
  0xfe   :  { %v2431_v24 = vpop.eup %2430 }
  0xff   :  { %v277_v25 = vadd.f32 1.0, %v2431_v24 }
 0x101   :  { %2432 = vrcp.f32 %v277_v25 }
 0x10b   :  { %v2433_v26 = vpop.eup %2432 }
 0x10c   :  { %v291_v32 = vsub.f32 1.0, %v2433_v26  ;;  %v297_v34 = vmul.f32 0.0, %v2433_v26 }
 0x159   :  { %v282_v27 = vpop.permute.xlu0 %281 }
 0x15a   :  { %v284_v28 = vmul.f32 %v2433_v26, %v282_v27 }
 0x15c   :  { %286 = vrot.lane.b32.xlu0 %v284_v28, %s2539_s2 }
 0x1ce   :  { %v287_v29 = vpop.permute.xlu0 %286 }
 0x1cf   :  { %v289_v30 = vadd.f32 %v287_v29, %v176_v21 }
 0x1d1   :  { %2434 = vtanh.f32 %v289_v30 }
 0x1db   :  { %v2435_v31 = vpop.eup %2434 }
 0x1dc   :  { %293 = vrot.lane.b32.xlu1 %v2435_v31, %s2540_s19 }
 0x24e   :  { %v294_v33 = vpop.permute.xlu1 %293 }
 0x24f   :  { %v296_v35 = vmul.f32 %v294_v33, %v291_v32  ;;  %v2760_v32 = vpop.f32.mrb[4].mxu0 }
 0x250   :  { %v2762_v33 = vpop.f32.mrb[5].mxu0 }
 0x251   :  { %v2705_v36 = vadd.f32 %v297_v34, %v296_v35  ;;  %v2764_v34 = vpop.f32.mrb[6].mxu0 }
 0x252   :  { %v2766_v35 = vpop.f32.mrb[7].mxu0 }
 0x253   :  { %v299_v37 = vpack.c.bf16 %v2705_v36, %v2705_v36  ;;  %v373_v56 = vrot.slane %v2705_v36, 4 }
 0x255   :  { %301 = vrot.lane.b32.xlu1 %v299_v37, %s2540_s19 }
 0x2c7   :  { %v302_v38 = vpop.permute.xlu1 %301 }
 0x2c8   :  { %2191 = vmatmul.mubr.msk.bf16.vlgmr.msra.gmra.mrb[4].mxu1 %vm229_vm2, %v302_v38 }
 0x2c9   :  { %2195 = vmatpush3.bf16.msra.mxu1 %v2645_v2  ;;  %2198 = vmatprep.mubr.msk.bf16.mxu1 %vm2537_vm0, %v3373_v0 }
 0x2ca   :  { %2196 = vmatprep.subr.bf16.mxu1 %v3373_v0 }
 0x2cd   :  { %2197 = vmatpush3.bf16.msra.mxu1 %v2654_v5 }
 0x2ce   :  { %2210 = vmatprep.subr.bf16.mxu1 %v3373_v0 }
 0x39b   :  { %v340_v39 = vpop.f32.mrb[4].mxu1 }
 0x39c   :  { %v341_v40 = vadd.f32 %v2687_v10, %v340_v39  ;;  %v2192_v41 = vpop.f32.mrb[5].mxu1 }
 0x39d   :  { %v343_v42 = vpop.f32.mrb[6].mxu1 }
 0x39e   :  { %v347_v43 = vrot.slane %v341_v40, 4  ;;  %v2193_v44 = vpop.f32.mrb[7].mxu1 }
 0x3a0   :  { %356 = vrot.lane.b32.xlu0 %v347_v43, %s2539_s2  ;;  %v349_v45 = vadd.f32 %v347_v43, %v176_v21 }
 0x3a2   :  { %v2052_v46 = vmul.f32 -1.442695, %v349_v45 }
 0x3a4   :  { %2436 = vpow2.f32 %v2052_v46 }
 0x3ae   :  { %v2437_v47 = vpop.eup %2436 }
 0x3af   :  { %v353_v48 = vadd.f32 1.0, %v2437_v47 }
 0x3b1   :  { %2438 = vrcp.f32 %v353_v48 }
 0x3bb   :  { %v2439_v49 = vpop.eup %2438 }
 0x3bc   :  { %v366_v55 = vsub.f32 1.0, %v2439_v49  ;;  %v375_v58 = vmul.f32 %v2439_v49, %v373_v56 }
 0x412   :  { %v357_v50 = vpop.permute.xlu0 %356 }
 0x413   :  { %v359_v51 = vmul.f32 %v2439_v49, %v357_v50 }
 0x415   :  { %361 = vrot.lane.b32.xlu1 %v359_v51, %s2539_s2 }
 0x487   :  { %v362_v52 = vpop.permute.xlu1 %361 }
 0x488   :  { %v364_v53 = vadd.f32 %v362_v52, %v176_v21 }
 0x48a   :  { %2440 = vtanh.f32 %v364_v53 }
 0x494   :  { %v2441_v54 = vpop.eup %2440 }
 0x495   :  { %368 = vrot.lane.b32.xlu0 %v2441_v54, %s2540_s19 }
 0x507   :  { %v369_v57 = vpop.permute.xlu0 %368 }
 0x508   :  { %v371_v59 = vmul.f32 %v369_v57, %v366_v55 }
 0x50a   :  { %v2724_v60 = vadd.f32 %v375_v58, %v371_v59 }
 0x50c   :  { %v377_v61 = vpack.c.bf16 %v2724_v60, %v2724_v60  ;;  %v450_v25 = vrot.slane %v2724_v60, 4 }
 0x50e   :  { %v379_v62 = vrot.slane %v377_v61, 2 }
 0x510   :  { %380 = vrot.lane.b32.xlu1 %v379_v62, %s2540_s19 }
 0x582   :  { %v381_v63 = vpop.permute.xlu1 %380 }
 0x583   :  { %2199 = vmatmul.mubr.msk.bf16.vlgmr.msra.gmra.mrb[8].mxu1 %vm229_vm2, %v381_v63 }
 0x584   :  { %2211 = vmatpush3.bf16.msra.mxu1 %v2645_v2  ;;  %2214 = vmatprep.mubr.msk.bf16.mxu1 %vm2537_vm0, %v3373_v0 }
 0x585   :  { %2212 = vmatprep.subr.bf16.mxu1 %v3373_v0 }
 0x588   :  { %2213 = vmatpush3.bf16.msra.mxu1 %v2654_v5 }
 0x589   :  { %2226 = vmatprep.subr.bf16.mxu1 %v3373_v0 }
 0x656   :  { %v419_v1 = vpop.f32.mrb[8].mxu1 }
 0x657   :  { %v420_v3 = vadd.f32 %v2687_v10, %v419_v1  ;;  %v2200_v4 = vpop.f32.mrb[9].mxu1 }
 0x658   :  { %v422_v6 = vpop.f32.mrb[10].mxu1 }
 0x659   :  { %433 = vrot.lane.b32.xlu0 %v420_v3, %s2539_s2  ;;  %v2201_v7 = vpop.f32.mrb[11].mxu1  ;;  %v425_v9 = vadd.f32 %v420_v3, %v179_v8 }
 0x65b   :  { %v2054_v11 = vmul.f32 -1.442695, %v425_v9  ;;  %v184_v9 = vadd.f32 %v2691_v16, %v2700_v20 }
 0x65d   :  { %2442 = vpow2.f32 %v2054_v11 }
 0x667   :  { %v2443_v12 = vpop.eup %2442 }
 0x668   :  { %v429_v13 = vadd.f32 1.0, %v2443_v12 }
 0x66a   :  { %2444 = vrcp.f32 %v429_v13 }
 0x674   :  { %v2445_v14 = vpop.eup %2444 }
 0x675   :  { %v443_v26 = vsub.f32 1.0, %v2445_v14  ;;  %v452_v28 = vmul.f32 %v2445_v14, %v450_v25 }
 0x6cb   :  { %v434_v15 = vpop.permute.xlu0 %433 }
 0x6cc   :  { %v436_v17 = vmul.f32 %v2445_v14, %v434_v15 }
 0x6ce   :  { %438 = vrot.lane.b32.xlu1 %v436_v17, %s2539_s2 }
 0x740   :  { %v439_v21 = vpop.permute.xlu1 %438 }
 0x741   :  { %v441_v22 = vadd.f32 %v439_v21, %v179_v8 }
 0x743   :  { %2446 = vtanh.f32 %v441_v22 }
 0x74d   :  { %v2447_v24 = vpop.eup %2446 }
 0x74e   :  { %445 = vrot.lane.b32.xlu0 %v2447_v24, %s2540_s19 }
 0x7c0   :  { %v446_v27 = vpop.permute.xlu0 %445 }
 0x7c1   :  { %v448_v29 = vmul.f32 %v446_v27, %v443_v26 }
 0x7c3   :  { %v2755_v30 = vadd.f32 %v452_v28, %v448_v29 }
 0x7c5   :  { %v454_v31 = vpack.c.bf16 %v2755_v30, %v2755_v30  ;;  %v528_v55 = vrot.slane %v2755_v30, 4 }
 0x7c7   :  { %456 = vrot.lane.b32.xlu1 %v454_v31, %s2540_s19 }
 0x839   :  { %v457_v37 = vpop.permute.xlu1 %456 }
 0x83a   :  { %2207 = vmatmul.mubr.msk.bf16.vlgmr.msra.gmra.mrb[8].mxu0 %vm229_vm2, %v457_v37 }
 0x83b   :  { %2219 = vmatpush3.bf16.msra.mxu0 %v2645_v2  ;;  %2222 = vmatprep.mubr.msk.bf16.mxu0 %vm2537_vm0, %v3373_v0 }
 0x83c   :  { %2220 = vmatprep.subr.bf16.mxu0 %v3373_v0 }
 0x83f   :  { %2221 = vmatpush3.bf16.msra.mxu0 %v2654_v5 }
 0x840   :  { %2234 = vmatprep.subr.bf16.mxu0 %v3373_v0 }
 0x90d   :  { %v495_v38 = vpop.f32.mrb[8].mxu0 }
 0x90e   :  { %v496_v39 = vadd.f32 %v2687_v10, %v495_v38  ;;  %v2208_v40 = vpop.f32.mrb[9].mxu0 }
 0x90f   :  { %v498_v41 = vpop.f32.mrb[10].mxu0 }
 0x910   :  { %v502_v42 = vrot.slane %v496_v39, 4  ;;  %v2209_v43 = vpop.f32.mrb[11].mxu0 }
 0x912   :  { %511 = vrot.lane.b32.xlu0 %v502_v42, %s2539_s2  ;;  %v504_v44 = vadd.f32 %v502_v42, %v179_v8 }
 0x914   :  { %v2056_v45 = vmul.f32 -1.442695, %v504_v44 }
 0x916   :  { %2448 = vpow2.f32 %v2056_v45 }
 0x920   :  { %v2449_v46 = vpop.eup %2448 }
 0x921   :  { %v508_v47 = vadd.f32 1.0, %v2449_v46 }
 0x923   :  { %2450 = vrcp.f32 %v508_v47 }
 0x92d   :  { %v2451_v48 = vpop.eup %2450 }
 0x92e   :  { %v521_v54 = vsub.f32 1.0, %v2451_v48  ;;  %v530_v58 = vmul.f32 %v2451_v48, %v528_v55 }
 0x984   :  { %v512_v49 = vpop.permute.xlu0 %511 }
 0x985   :  { %v514_v50 = vmul.f32 %v2451_v48, %v512_v49 }
 0x987   :  { %516 = vrot.lane.b32.xlu1 %v514_v50, %s2539_s2 }
 0x9f9   :  { %v517_v51 = vpop.permute.xlu1 %516 }
 0x9fa   :  { %v519_v52 = vadd.f32 %v517_v51, %v179_v8 }
 0x9fc   :  { %2452 = vtanh.f32 %v519_v52 }
 0xa06   :  { %v2453_v53 = vpop.eup %2452 }
 0xa07   :  { %523 = vrot.lane.b32.xlu0 %v2453_v53, %s2540_s19 }
 0xa79   :  { %v524_v57 = vpop.permute.xlu0 %523 }
 0xa7a   :  { %v526_v59 = vmul.f32 %v524_v57, %v521_v54 }
 0xa7c   :  { %v2782_v61 = vadd.f32 %v530_v58, %v526_v59 }
 0xa7e   :  { %v532_v62 = vpack.c.bf16 %v2782_v61, %v2782_v61  ;;  %v605_v24 = vrot.slane %v2782_v61, 4 }
 0xa80   :  { %v534_v63 = vrot.slane %v532_v62, 2 }
 0xa82   :  { %535 = vrot.lane.b32.xlu1 %v534_v63, %s2540_s19 }
 0xaf4   :  { %v536_v1 = vpop.permute.xlu1 %535 }
 0xaf5   :  { %2215 = vmatmul.mubr.msk.bf16.vlgmr.msra.gmra.mrb[12].mxu1 %vm229_vm2, %v536_v1 }
 0xaf6   :  { %2227 = vmatpush3.bf16.msra.mxu1 %v2645_v2  ;;  %2230 = vmatprep.mubr.msk.bf16.mxu1 %vm2537_vm0, %v3373_v0 }
 0xaf7   :  { %2228 = vmatprep.subr.bf16.mxu1 %v3373_v0 }
 0xafa   :  { %2229 = vmatpush3.bf16.msra.mxu1 %v2654_v5 }
 0xafb   :  { %2242 = vmatprep.subr.bf16.mxu1 %v3373_v0 }
 0xbc8   :  { %v574_v3 = vpop.f32.mrb[12].mxu1 }
 0xbc9   :  { %v575_v4 = vadd.f32 %v2687_v10, %v574_v3  ;;  %v2216_v6 = vpop.f32.mrb[13].mxu1 }
 0xbca   :  { %v577_v7 = vpop.f32.mrb[14].mxu1 }
 0xbcb   :  { %588 = vrot.lane.b32.xlu0 %v575_v4, %s2539_s2  ;;  %v2217_v8 = vpop.f32.mrb[15].mxu1  ;;  %v580_v11 = vadd.f32 %v575_v4, %v184_v9 }
 0xbcd   :  { %v2058_v12 = vmul.f32 -1.442695, %v580_v11 }
 0xbcf   :  { %2454 = vpow2.f32 %v2058_v12  ;;  %v187_v12 = vadd.f32 %v2693_v18, %v2700_v20 }
 0xbd9   :  { %v2455_v13 = vpop.eup %2454 }
 0xbda   :  { %v584_v14 = vadd.f32 1.0, %v2455_v13 }
 0xbdc   :  { %2456 = vrcp.f32 %v584_v14 }
 0xbe6   :  { %v2457_v15 = vpop.eup %2456 }
 0xbe7   :  { %v598_v16 = vsub.f32 1.0, %v2457_v15  ;;  %v607_v27 = vmul.f32 %v2457_v15, %v605_v24 }
 0xc3d   :  { %v589_v17 = vpop.permute.xlu0 %588 }
 0xc3e   :  { %v591_v21 = vmul.f32 %v2457_v15, %v589_v17 }
 0xc40   :  { %593 = vrot.lane.b32.xlu1 %v591_v21, %s2539_s2 }
 0xcb2   :  { %v594_v22 = vpop.permute.xlu1 %593 }
 0xcb3   :  { %v596_v23 = vadd.f32 %v594_v22, %v184_v9 }
 0xcb5   :  { %2458 = vtanh.f32 %v596_v23 }
 0xcbf   :  { %v2459_v19 = vpop.eup %2458 }
 0xcc0   :  { %600 = vrot.lane.b32.xlu0 %v2459_v19, %s2540_s19 }
 0xd32   :  { %v601_v26 = vpop.permute.xlu0 %600 }
 0xd33   :  { %v603_v28 = vmul.f32 %v601_v26, %v598_v16 }
 0xd35   :  { %v2803_v29 = vadd.f32 %v607_v27, %v603_v28 }
 0xd37   :  { %v609_v31 = vpack.c.bf16 %v2803_v29, %v2803_v29  ;;  %v683_v57 = vrot.slane %v2803_v29, 4 }
 0xd39   :  { %611 = vrot.lane.b32.xlu1 %v609_v31, %s2540_s19 }
 0xdab   :  { %v612_v37 = vpop.permute.xlu1 %611 }
 0xdac   :  { %2223 = vmatmul.mubr.msk.bf16.vlgmr.msra.gmra.mrb[12].mxu0 %vm229_vm2, %v612_v37 }
 0xdad   :  { %2235 = vmatpush3.bf16.msra.mxu0 %v2645_v2  ;;  %2238 = vmatprep.mubr.msk.bf16.mxu0 %vm2537_vm0, %v3373_v0 }
 0xdae   :  { %2236 = vmatprep.subr.bf16.mxu0 %v3373_v0 }
 0xdb1   :  { %2237 = vmatpush3.bf16.msra.mxu0 %v2654_v5 }
 0xdb2   :  { %2250 = vmatprep.subr.bf16.mxu0 %v3373_v0 }
 0xe7f   :  { %v650_v38 = vpop.f32.mrb[12].mxu0 }
 0xe80   :  { %v651_v39 = vadd.f32 %v2687_v10, %v650_v38  ;;  %v2224_v40 = vpop.f32.mrb[13].mxu0 }
 0xe81   :  { %v653_v41 = vpop.f32.mrb[14].mxu0 }
 0xe82   :  { %v657_v42 = vrot.slane %v651_v39, 4  ;;  %v2225_v43 = vpop.f32.mrb[15].mxu0 }
 0xe84   :  { %666 = vrot.lane.b32.xlu0 %v657_v42, %s2539_s2  ;;  %v659_v44 = vadd.f32 %v657_v42, %v184_v9 }
 0xe86   :  { %v2060_v45 = vmul.f32 -1.442695, %v659_v44 }
 0xe88   :  { %2460 = vpow2.f32 %v2060_v45 }
 0xe92   :  { %v2461_v46 = vpop.eup %2460 }
 0xe93   :  { %v663_v47 = vadd.f32 1.0, %v2461_v46 }
 0xe95   :  { %2462 = vrcp.f32 %v663_v47 }
 0xe9f   :  { %v2463_v48 = vpop.eup %2462 }
 0xea0   :  { %v676_v54 = vsub.f32 1.0, %v2463_v48  ;;  %v685_v59 = vmul.f32 %v2463_v48, %v683_v57 }
 0xef6   :  { %v667_v49 = vpop.permute.xlu0 %666 }
 0xef7   :  { %v669_v50 = vmul.f32 %v2463_v48, %v667_v49 }
 0xef9   :  { %671 = vrot.lane.b32.xlu1 %v669_v50, %s2539_s2 }
 0xf6b   :  { %v672_v51 = vpop.permute.xlu1 %671 }
 0xf6c   :  { %v674_v52 = vadd.f32 %v672_v51, %v184_v9 }
 0xf6e   :  { %2464 = vtanh.f32 %v674_v52 }
 0xf78   :  { %v2465_v53 = vpop.eup %2464 }
 0xf79   :  { %678 = vrot.lane.b32.xlu0 %v2465_v53, %s2540_s19 }
 0xfeb   :  { %v679_v58 = vpop.permute.xlu0 %678 }
 0xfec   :  { %v681_v62 = vmul.f32 %v679_v58, %v676_v54 }
 0xfee   :  { %v2822_v63 = vadd.f32 %v685_v59, %v681_v62 }
 0xff0   :  { %v687_v1 = vpack.c.bf16 %v2822_v63, %v2822_v63  ;;  %v760_v27 = vrot.slane %v2822_v63, 4 }
 0xff2   :  { %v689_v3 = vrot.slane %v687_v1, 2 }
 0xff4   :  { %690 = vrot.lane.b32.xlu1 %v689_v3, %s2540_s19 }
0x1066   :  { %v691_v4 = vpop.permute.xlu1 %690 }
0x1067   :  { %2231 = vmatmul.mubr.msk.bf16.vlgmr.msra.gmra.mrb[16].mxu1 %vm229_vm2, %v691_v4 }
0x1068   :  { %2243 = vmatpush3.bf16.msra.mxu1 %v2645_v2  ;;  %2246 = vmatprep.mubr.msk.bf16.mxu1 %vm2537_vm0, %v3373_v0 }
0x1069   :  { %2244 = vmatprep.subr.bf16.mxu1 %v3373_v0 }
0x106c   :  { %2245 = vmatpush3.bf16.msra.mxu1 %v2654_v5 }
0x106d   :  { %2258 = vmatprep.subr.bf16.mxu1 %v3373_v0 }
0x113a   :  { %v729_v6 = vpop.f32.mrb[16].mxu1 }
0x113b   :  { %v730_v7 = vadd.f32 %v2687_v10, %v729_v6  ;;  %v2232_v8 = vpop.f32.mrb[17].mxu1 }
0x113c   :  { %v732_v9 = vpop.f32.mrb[18].mxu1 }
0x113d   :  { %743 = vrot.lane.b32.xlu0 %v730_v7, %s2539_s2  ;;  %v2233_v11 = vpop.f32.mrb[19].mxu1  ;;  %v735_v13 = vadd.f32 %v730_v7, %v187_v12 }
0x113f   :  { %v2062_v14 = vmul.f32 -1.442695, %v735_v13 }
0x1141   :  { %2466 = vpow2.f32 %v2062_v14 }
0x114b   :  { %v2467_v15 = vpop.eup %2466 }
0x114c   :  { %v739_v17 = vadd.f32 1.0, %v2467_v15 }
0x114e   :  { %2468 = vrcp.f32 %v739_v17 }
0x1158   :  { %v2469_v21 = vpop.eup %2468 }
0x1159   :  { %v753_v18 = vsub.f32 1.0, %v2469_v21  ;;  %v762_v31 = vmul.f32 %v2469_v21, %v760_v27 }
0x11af   :  { %v744_v22 = vpop.permute.xlu0 %743 }
0x11b0   :  { %v746_v23 = vmul.f32 %v2469_v21, %v744_v22  ;;  %v192_v21 = vadd.f32 %v2700_v20, %v2762_v33 }
0x11b2   :  { %748 = vrot.lane.b32.xlu1 %v746_v23, %s2539_s2 }
0x1224   :  { %v749_v19 = vpop.permute.xlu1 %748 }
0x1225   :  { %v751_v16 = vadd.f32 %v749_v19, %v187_v12 }
0x1227   :  { %2470 = vtanh.f32 %v751_v16 }
0x1231   :  { %v2471_v26 = vpop.eup %2470 }
0x1232   :  { %755 = vrot.lane.b32.xlu0 %v2471_v26, %s2540_s19 }
0x12a4   :  { %v756_v28 = vpop.permute.xlu0 %755 }
0x12a5   :  { %v758_v37 = vmul.f32 %v756_v28, %v753_v18 }
0x12a7   :  { %v2843_v38 = vadd.f32 %v762_v31, %v758_v37 }
0x12a9   :  { %v764_v39 = vpack.c.bf16 %v2843_v38, %v2843_v38  ;;  %v838_v1 = vrot.slane %v2843_v38, 4 }
0x12ab   :  { %766 = vrot.lane.b32.xlu1 %v764_v39, %s2540_s19 }
0x131d   :  { %v767_v40 = vpop.permute.xlu1 %766 }
0x131e   :  { %2239 = vmatmul.mubr.msk.bf16.vlgmr.msra.gmra.mrb[16].mxu0 %vm229_vm2, %v767_v40 }
0x131f   :  { %2251 = vmatpush3.bf16.msra.mxu0 %v2645_v2  ;;  %2254 = vmatprep.mubr.msk.bf16.mxu0 %vm2537_vm0, %v3373_v0 }
0x1320   :  { %2252 = vmatprep.subr.bf16.mxu0 %v3373_v0 }
0x1323   :  { %2253 = vmatpush3.bf16.msra.mxu0 %v2654_v5 }
0x1324   :  { %2266 = vmatprep.subr.bf16.mxu0 %v3373_v0 }
0x13f1   :  { %v805_v41 = vpop.f32.mrb[16].mxu0 }
0x13f2   :  { %v806_v42 = vadd.f32 %v2687_v10, %v805_v41  ;;  %v2240_v43 = vpop.f32.mrb[17].mxu0 }
0x13f3   :  { %v808_v44 = vpop.f32.mrb[18].mxu0 }
0x13f4   :  { %v812_v45 = vrot.slane %v806_v42, 4  ;;  %v2241_v46 = vpop.f32.mrb[19].mxu0 }
0x13f6   :  { %821 = vrot.lane.b32.xlu0 %v812_v45, %s2539_s2  ;;  %v814_v47 = vadd.f32 %v812_v45, %v187_v12 }
0x13f8   :  { %v2064_v48 = vmul.f32 -1.442695, %v814_v47 }
0x13fa   :  { %2472 = vpow2.f32 %v2064_v48 }
0x1404   :  { %v2473_v49 = vpop.eup %2472 }
0x1405   :  { %v818_v50 = vadd.f32 1.0, %v2473_v49 }
0x1407   :  { %2474 = vrcp.f32 %v818_v50 }
0x1411   :  { %v2475_v51 = vpop.eup %2474 }
0x1412   :  { %v831_v62 = vsub.f32 1.0, %v2475_v51  ;;  %v840_v4 = vmul.f32 %v2475_v51, %v838_v1 }
0x1468   :  { %v822_v52 = vpop.permute.xlu0 %821 }
0x1469   :  { %v824_v53 = vmul.f32 %v2475_v51, %v822_v52 }
0x146b   :  { %826 = vrot.lane.b32.xlu1 %v824_v53, %s2539_s2 }
0x14dd   :  { %v827_v54 = vpop.permute.xlu1 %826 }
0x14de   :  { %v829_v58 = vadd.f32 %v827_v54, %v187_v12 }
0x14e0   :  { %2476 = vtanh.f32 %v829_v58 }
0x14ea   :  { %v2477_v59 = vpop.eup %2476 }
0x14eb   :  { %833 = vrot.lane.b32.xlu0 %v2477_v59, %s2540_s19 }
0x155d   :  { %v834_v3 = vpop.permute.xlu0 %833 }
0x155e   :  { %v836_v6 = vmul.f32 %v834_v3, %v831_v62 }
0x1560   :  { %v2862_v7 = vadd.f32 %v840_v4, %v836_v6 }
0x1562   :  { %v842_v8 = vpack.c.bf16 %v2862_v7, %v2862_v7  ;;  %v915_v40 = vrot.slane %v2862_v7, 4 }
0x1564   :  { %v844_v9 = vrot.slane %v842_v8, 2 }
0x1566   :  { %845 = vrot.lane.b32.xlu1 %v844_v9, %s2540_s19 }
0x15d8   :  { %v846_v11 = vpop.permute.xlu1 %845 }
0x15d9   :  { %2247 = vmatmul.mubr.msk.bf16.vlgmr.msra.gmra.mrb[20].mxu1 %vm229_vm2, %v846_v11 }
0x15da   :  { %2259 = vmatpush3.bf16.msra.mxu1 %v2645_v2  ;;  %2262 = vmatprep.mubr.msk.bf16.mxu1 %vm2537_vm0, %v3373_v0 }
0x15db   :  { %2260 = vmatprep.subr.bf16.mxu1 %v3373_v0 }
0x15de   :  { %2261 = vmatpush3.bf16.msra.mxu1 %v2654_v5 }
0x15df   :  { %2274 = vmatprep.subr.bf16.mxu1 %v3373_v0 }
0x16ac   :  { %v884_v12 = vpop.f32.mrb[20].mxu1 }
0x16ad   :  { %v885_v13 = vadd.f32 %v2687_v10, %v884_v12  ;;  %v2248_v14 = vpop.f32.mrb[21].mxu1 }
0x16ae   :  { %v887_v15 = vpop.f32.mrb[22].mxu1 }
0x16af   :  { %898 = vrot.lane.b32.xlu0 %v885_v13, %s2539_s2  ;;  %v2249_v17 = vpop.f32.mrb[23].mxu1  ;;  %v890_v22 = vadd.f32 %v885_v13, %v192_v21 }
0x16b1   :  { %v2066_v23 = vmul.f32 -1.442695, %v890_v22 }
0x16b3   :  { %2478 = vpow2.f32 %v2066_v23 }
0x16bd   :  { %v2479_v19 = vpop.eup %2478 }
0x16be   :  { %v894_v16 = vadd.f32 1.0, %v2479_v19 }
0x16c0   :  { %2480 = vrcp.f32 %v894_v16 }
0x16ca   :  { %v2481_v26 = vpop.eup %2480 }
0x16cb   :  { %v908_v33 = vsub.f32 1.0, %v2481_v26  ;;  %v917_v42 = vmul.f32 %v2481_v26, %v915_v40 }
0x1721   :  { %v899_v18 = vpop.permute.xlu0 %898 }
0x1722   :  { %v901_v28 = vmul.f32 %v2481_v26, %v899_v18 }
0x1724   :  { %903 = vrot.lane.b32.xlu1 %v901_v28, %s2539_s2 }
0x1796   :  { %v904_v31 = vpop.permute.xlu1 %903 }
0x1797   :  { %v906_v37 = vadd.f32 %v904_v31, %v192_v21  ;;  %v195_v31 = vadd.f32 %v2700_v20, %v2766_v35 }
0x1799   :  { %2482 = vtanh.f32 %v906_v37 }
0x17a3   :  { %v2483_v39 = vpop.eup %2482 }
0x17a4   :  { %910 = vrot.lane.b32.xlu0 %v2483_v39, %s2540_s19 }
0x1816   :  { %v911_v41 = vpop.permute.xlu0 %910 }
0x1817   :  { %v913_v43 = vmul.f32 %v911_v41, %v908_v33 }
0x1819   :  { %v2883_v44 = vadd.f32 %v917_v42, %v913_v43 }
0x181b   :  { %v919_v45 = vpack.c.bf16 %v2883_v44, %v2883_v44  ;;  %v993_v12 = vrot.slane %v2883_v44, 4 }
0x181d   :  { %921 = vrot.lane.b32.xlu1 %v919_v45, %s2540_s19 }
0x188f   :  { %v922_v46 = vpop.permute.xlu1 %921 }
0x1890   :  { %2255 = vmatmul.mubr.msk.bf16.vlgmr.msra.gmra.mrb[20].mxu0 %vm229_vm2, %v922_v46 }
0x1891   :  { %2267 = vmatpush3.bf16.msra.mxu0 %v2645_v2  ;;  %2270 = vmatprep.mubr.msk.bf16.mxu0 %vm2537_vm0, %v3373_v0 }
0x1892   :  { %2268 = vmatprep.subr.bf16.mxu0 %v3373_v0 }
0x1895   :  { %2269 = vmatpush3.bf16.msra.mxu0 %v2654_v5 }
0x1896   :  { %2282 = vmatprep.subr.bf16.mxu0 %v3373_v0 }
0x1963   :  { %v960_v47 = vpop.f32.mrb[20].mxu0 }
0x1964   :  { %v961_v48 = vadd.f32 %v2687_v10, %v960_v47  ;;  %v2256_v49 = vpop.f32.mrb[21].mxu0 }
0x1965   :  { %v963_v50 = vpop.f32.mrb[22].mxu0 }
0x1966   :  { %v967_v51 = vrot.slane %v961_v48, 4  ;;  %v2257_v52 = vpop.f32.mrb[23].mxu0 }
0x1968   :  { %976 = vrot.lane.b32.xlu0 %v967_v51, %s2539_s2  ;;  %v969_v53 = vadd.f32 %v967_v51, %v192_v21 }
0x196a   :  { %v2068_v54 = vmul.f32 -1.442695, %v969_v53 }
0x196c   :  { %2484 = vpow2.f32 %v2068_v54 }
0x1976   :  { %v2485_v58 = vpop.eup %2484 }
0x1977   :  { %v973_v59 = vadd.f32 1.0, %v2485_v58 }
0x1979   :  { %2486 = vrcp.f32 %v973_v59 }
0x1983   :  { %v2487_v62 = vpop.eup %2486 }
0x1984   :  { %v986_v11 = vsub.f32 1.0, %v2487_v62  ;;  %v995_v14 = vmul.f32 %v2487_v62, %v993_v12 }
0x19da   :  { %v977_v3 = vpop.permute.xlu0 %976 }
0x19db   :  { %v979_v4 = vmul.f32 %v2487_v62, %v977_v3 }
0x19dd   :  { %981 = vrot.lane.b32.xlu1 %v979_v4, %s2539_s2 }
0x1a4f   :  { %v982_v6 = vpop.permute.xlu1 %981 }
0x1a50   :  { %v984_v8 = vadd.f32 %v982_v6, %v192_v21 }
0x1a52   :  { %2488 = vtanh.f32 %v984_v8 }
0x1a5c   :  { %v2489_v9 = vpop.eup %2488 }
0x1a5d   :  { %988 = vrot.lane.b32.xlu0 %v2489_v9, %s2540_s19 }
0x1acf   :  { %v989_v13 = vpop.permute.xlu0 %988 }
0x1ad0   :  { %v991_v15 = vmul.f32 %v989_v13, %v986_v11 }
0x1ad2   :  { %v2902_v17 = vadd.f32 %v995_v14, %v991_v15 }
0x1ad4   :  { %v997_v22 = vpack.c.bf16 %v2902_v17, %v2902_v17  ;;  %v1070_v49 = vrot.slane %v2902_v17, 4 }
0x1ad6   :  { %v999_v23 = vrot.slane %v997_v22, 2  ;;  %v2348_v61 = vpack.i.bf16 %v1070_v49, %v760_v27 }
0x1ad8   :  { %1000 = vrot.lane.b32.xlu1 %v999_v23, %s2540_s19 }
0x1b4a   :  { %v1001_v21 = vpop.permute.xlu1 %1000 }
0x1b4b   :  { %2263 = vmatmul.mubr.msk.bf16.vlgmr.msra.gmra.mrb[24].mxu1 %vm229_vm2, %v1001_v21 }
0x1b4c   :  { %2275 = vmatpush3.bf16.msra.mxu1 %v2645_v2  ;;  %2278 = vmatprep.mubr.msk.bf16.mxu1 %vm2537_vm0, %v3373_v0 }
0x1b4d   :  { %2276 = vmatprep.subr.bf16.mxu1 %v3373_v0 }
0x1b50   :  { %2277 = vmatpush3.bf16.msra.mxu1 %v2654_v5 }
0x1b51   :  { %2290 = vmatprep.subr.bf16.mxu1 %v3373_v0 }
0x1c1e   :  { %v1039_v19 = vpop.f32.mrb[24].mxu1 }
0x1c1f   :  { %v1040_v16 = vadd.f32 %v2687_v10, %v1039_v19  ;;  %v2264_v26 = vpop.f32.mrb[25].mxu1 }
0x1c20   :  { %v1042_v18 = vpop.f32.mrb[26].mxu1 }
0x1c21   :  { %1053 = vrot.lane.b32.xlu0 %v1040_v16, %s2539_s2  ;;  %v2265_v28 = vpop.f32.mrb[27].mxu1  ;;  %v1045_v37 = vadd.f32 %v1040_v16, %v195_v31 }
0x1c23   :  { %v2070_v39 = vmul.f32 -1.442695, %v1045_v37 }
0x1c25   :  { %2490 = vpow2.f32 %v2070_v39 }
0x1c2f   :  { %v2491_v33 = vpop.eup %2490 }
0x1c30   :  { %v1049_v41 = vadd.f32 1.0, %v2491_v33 }
0x1c32   :  { %2492 = vrcp.f32 %v1049_v41 }
0x1c3c   :  { %v2493_v42 = vpop.eup %2492 }
0x1c3d   :  { %v1063_v35 = vsub.f32 1.0, %v2493_v42  ;;  %v1072_v51 = vmul.f32 %v2493_v42, %v1070_v49 }
0x1c93   :  { %v1054_v43 = vpop.permute.xlu0 %1053 }
0x1c94   :  { %v1056_v45 = vmul.f32 %v2493_v42, %v1054_v43  ;;  %v2532_v42 = vld [vmem:[%s3378_s29] sm:$0xff]  }
0x1c96   :  { %1058 = vrot.lane.b32.xlu1 %v1056_v45, %s2539_s2 }
0x1d08   :  { %v1059_v46 = vpop.permute.xlu1 %1058 }
0x1d09   :  { %v1061_v47 = vadd.f32 %v1059_v46, %v195_v31 }
0x1d0b   :  { %2494 = vtanh.f32 %v1061_v47 }
0x1d15   :  { %v2495_v48 = vpop.eup %2494 }
0x1d16   :  { %1065 = vrot.lane.b32.xlu0 %v2495_v48, %s2540_s19 }
0x1d88   :  { %v1066_v50 = vpop.permute.xlu0 %1065 }
0x1d89   :  { %v1068_v52 = vmul.f32 %v1066_v50, %v1063_v35  ;;  %v200_v35 = vadd.f32 %v2760_v32, %v2700_v20 }
0x1d8b   :  { %v2923_v53 = vadd.f32 %v1072_v51, %v1068_v52 }
0x1d8d   :  { %v1074_v54 = vpack.c.bf16 %v2923_v53, %v2923_v53  ;;  %v1148_v26 = vrot.slane %v2923_v53, 4 }
0x1d8f   :  { %1076 = vrot.lane.b32.xlu1 %v1074_v54, %s2540_s19 }
0x1e01   :  { %v1077_v58 = vpop.permute.xlu1 %1076 }
0x1e02   :  { %2271 = vmatmul.mubr.msk.bf16.vlgmr.msra.gmra.mrb[24].mxu0 %vm229_vm2, %v1077_v58 }
0x1e03   :  { %2283 = vmatpush3.bf16.msra.mxu0 %v2645_v2  ;;  %2286 = vmatprep.mubr.msk.bf16.mxu0 %vm2537_vm0, %v3373_v0 }
0x1e04   :  { %2284 = vmatprep.subr.bf16.mxu0 %v3373_v0 }
0x1e07   :  { %2285 = vmatpush3.bf16.msra.mxu0 %v2654_v5 }
0x1e08   :  { %2298 = vmatprep.subr.bf16.mxu0 %v3373_v0 }
0x1ed5   :  { %v1115_v59 = vpop.f32.mrb[24].mxu0 }
0x1ed6   :  { %v1116_v62 = vadd.f32 %v2687_v10, %v1115_v59  ;;  %v2272_v3 = vpop.f32.mrb[25].mxu0 }
0x1ed7   :  { %v1118_v4 = vpop.f32.mrb[26].mxu0 }
0x1ed8   :  { %v1122_v6 = vrot.slane %v1116_v62, 4  ;;  %v2273_v8 = vpop.f32.mrb[27].mxu0 }
0x1eda   :  { %1131 = vrot.lane.b32.xlu0 %v1122_v6, %s2539_s2  ;;  %v1124_v9 = vadd.f32 %v1122_v6, %v195_v31 }
0x1edc   :  { %v2072_v2 = vmul.f32 -1.442695, %v1124_v9 }
0x1ede   :  { %2496 = vpow2.f32 %v2072_v2 }
0x1ee8   :  { %v2497_v11 = vpop.eup %2496 }
0x1ee9   :  { %v1128_v13 = vadd.f32 1.0, %v2497_v11 }
0x1eeb   :  { %2498 = vrcp.f32 %v1128_v13 }
0x1ef5   :  { %v2499_v14 = vpop.eup %2498 }
0x1ef6   :  { %v1141_v16 = vsub.f32 1.0, %v2499_v14  ;;  %v1150_v28 = vmul.f32 %v2499_v14, %v1148_v26 }
0x1f4c   :  { %v1132_v15 = vpop.permute.xlu0 %1131 }
0x1f4d   :  { %v1134_v22 = vmul.f32 %v2499_v14, %v1132_v15  ;;  %v2533_v14 = vld [vmem:[%s3378_s29 + $0x8] sm:$0xff]  }
0x1f4f   :  { %1136 = vrot.lane.b32.xlu1 %v1134_v22, %s2539_s2 }
0x1fc1   :  { %v1137_v23 = vpop.permute.xlu1 %1136 }
0x1fc2   :  { %v1139_v21 = vadd.f32 %v1137_v23, %v195_v31 }
0x1fc4   :  { %2500 = vtanh.f32 %v1139_v21 }
0x1fce   :  { %v2501_v19 = vpop.eup %2500 }
0x1fcf   :  { %1143 = vrot.lane.b32.xlu0 %v2501_v19, %s2540_s19 }
0x2041   :  { %v1144_v18 = vpop.permute.xlu0 %1143 }
0x2042   :  { %v1146_v37 = vmul.f32 %v1144_v18, %v1141_v16 }
0x2044   :  { %v2942_v39 = vadd.f32 %v1150_v28, %v1146_v37 }
0x2046   :  { %v1152_v33 = vpack.c.bf16 %v2942_v39, %v2942_v39  ;;  %v1225_v6 = vrot.slane %v2942_v39, 4  ;;  %v1521_v39 = vrot.slane %v838_v1, 4  ;;  %v1519_v1 = vrot.slane %v1148_v26, 4 }
0x2048   :  { %v1154_v41 = vrot.slane %v1152_v33, 2 }
0x204a   :  { %1155 = vrot.lane.b32.xlu1 %v1154_v41, %s2540_s19 }
0x20bc   :  { %v1156_v31 = vpop.permute.xlu1 %1155 }
0x20bd   :  { %2279 = vmatmul.mubr.msk.bf16.vlgmr.msra.gmra.mrb[28].mxu1 %vm229_vm2, %v1156_v31 }
0x20be   :  { %2291 = vmatpush3.bf16.msra.mxu1 %v2532_v42  ;;  %2294 = vmatprep.mubr.msk.bf16.mxu1 %vm2537_vm0, %v3373_v0 }
0x20bf   :  { %2292 = vmatprep.subr.bf16.mxu1 %v3373_v0 }
0x20c2   :  { %2293 = vmatpush3.bf16.msra.mxu1 %v2654_v5 }
0x2190   :  { %v1194_v43 = vpop.f32.mrb[28].mxu1 }
0x2191   :  { %v1195_v45 = vadd.f32 %v2687_v10, %v1194_v43  ;;  %v2280_v46 = vpop.f32.mrb[29].mxu1 }
0x2192   :  { %v1197_v47 = vpop.f32.mrb[30].mxu1 }
0x2193   :  { %1208 = vrot.lane.b32.xlu0 %v1195_v45, %s2539_s2  ;;  %v2281_v48 = vpop.f32.mrb[31].mxu1  ;;  %v1200_v50 = vadd.f32 %v1195_v45, %v200_v35 }
0x2195   :  { %v2074_v51 = vmul.f32 -1.442695, %v1200_v50 }
0x2197   :  { %2502 = vpow2.f32 %v2074_v51 }
0x21a1   :  { %v2503_v52 = vpop.eup %2502 }
0x21a2   :  { %v1204_v54 = vadd.f32 1.0, %v2503_v52 }
0x21a4   :  { %2504 = vrcp.f32 %v1204_v54 }
0x21ae   :  { %v2505_v58 = vpop.eup %2504 }
0x21af   :  { %v1218_v20 = vsub.f32 1.0, %v2505_v58  ;;  %v1227_v8 = vmul.f32 %v2505_v58, %v1225_v6 }
0x2205   :  { %v1209_v59 = vpop.permute.xlu0 %1208 }
0x2206   :  { %v1211_v5 = vmul.f32 %v2505_v58, %v1209_v59 }
0x2208   :  { %1213 = vrot.lane.b32.xlu1 %v1211_v5, %s2539_s2  ;;  %v2534_v5 = vld [vmem:[%s3355_s5] ss:$0 sm:$0xff] }
0x227a   :  { %v1214_v62 = vpop.permute.xlu1 %1213 }
0x227b   :  { %v1216_v3 = vadd.f32 %v1214_v62, %v200_v35 }
0x227d   :  { %2506 = vtanh.f32 %v1216_v3 }
0x2287   :  { %v2507_v4 = vpop.eup %2506 }
0x2288   :  { %1220 = vrot.lane.b32.xlu0 %v2507_v4, %s2540_s19 }
0x22fa   :  { %v1221_v32 = vpop.permute.xlu0 %1220 }
0x22fb   :  { %v1223_v9 = vmul.f32 %v1221_v32, %v1218_v20  ;;  %v2535_v32 = vld [vmem:[%s3356_s3] ss:$0 sm:$0xff] }
0x22fd   :  { %v2964_v2 = vadd.f32 %v1227_v8, %v1223_v9  ;;  %v203_v8 = vadd.f32 %v2535_v32, %v2764_v34 }
0x22ff   :  { %v1229_v11 = vpack.c.bf16 %v2964_v2, %v2964_v2  ;;  %v1303_v47 = vrot.slane %v2964_v2, 4  ;;  %v2373_v7 = vpack.i.bf16 %v2964_v2, %v2803_v29  ;;  %v1523_v29 = vrot.slane %v528_v55, 4 }
0x2300   :  { %v1520_v2 = vrot.slane %v993_v12, 4 }
0x2301   :  { %1231 = vrot.lane.b32.xlu1 %v1229_v11, %s2540_s19 }
0x2373   :  { %v1232_v13 = vpop.permute.xlu1 %1231 }
0x2374   :  { %2287 = vmatmul.mubr.msk.bf16.vlgmr.msra.gmra.mrb[28].mxu0 %vm229_vm2, %v1232_v13 }
0x2375   :  { %2299 = vmatpush3.bf16.msra.mxu0 %v2532_v42  ;;  %2302 = vmatprep.mubr.msk.bf16.mxu0 %vm2537_vm0, %v3373_v0 }
0x2376   :  { %2300 = vmatprep.subr.bf16.mxu0 %v3373_v0 }
0x2379   :  { %2301 = vmatpush3.bf16.msra.mxu0 %v2533_v14 }
0x237a   :  { %2312 = vmatprep.subr.bf16.mxu0 %v3373_v0 }
0x2447   :  { %v1270_v15 = vpop.f32.mrb[28].mxu0 }
0x2448   :  { %v1271_v22 = vadd.f32 %v2687_v10, %v1270_v15  ;;  %v2288_v23 = vpop.f32.mrb[29].mxu0 }
0x2449   :  { %v1273_v21 = vpop.f32.mrb[30].mxu0 }
0x244a   :  { %v1277_v19 = vrot.slane %v1271_v22, 4  ;;  %v2289_v16 = vpop.f32.mrb[31].mxu0 }
0x244c   :  { %1286 = vrot.lane.b32.xlu0 %v1277_v19, %s2539_s2  ;;  %v1279_v18 = vadd.f32 %v1277_v19, %v200_v35 }
0x244e   :  { %v2076_v28 = vmul.f32 -1.442695, %v1279_v18 }
0x2450   :  { %2508 = vpow2.f32 %v2076_v28 }
0x245a   :  { %v2509_v37 = vpop.eup %2508 }
0x245b   :  { %v1283_v33 = vadd.f32 1.0, %v2509_v37 }
0x245d   :  { %2510 = vrcp.f32 %v1283_v33 }
0x2467   :  { %v2511_v41 = vpop.eup %2510 }
0x2468   :  { %v1296_v46 = vsub.f32 1.0, %v2511_v41  ;;  %v1305_v50 = vmul.f32 %v2511_v41, %v1303_v47 }
0x24be   :  { %v1287_v31 = vpop.permute.xlu0 %1286 }
0x24bf   :  { %v1289_v42 = vmul.f32 %v2511_v41, %v1287_v31 }
0x24c1   :  { %1291 = vrot.lane.b32.xlu1 %v1289_v42, %s2539_s2 }
0x2533   :  { %v1292_v43 = vpop.permute.xlu1 %1291 }
0x2534   :  { %v1294_v45 = vadd.f32 %v1292_v43, %v200_v35 }
0x2536   :  { %2512 = vtanh.f32 %v1294_v45 }
0x2540   :  { %v2513_v10 = vpop.eup %2512 }
0x2541   :  { %1298 = vrot.lane.b32.xlu0 %v2513_v10, %s2540_s19 }
0x25b3   :  { %v1299_v48 = vpop.permute.xlu0 %1298 }
0x25b4   :  { %v1301_v51 = vmul.f32 %v1299_v48, %v1296_v46 }
0x25b6   :  { %v2984_v52 = vadd.f32 %v1305_v50, %v1301_v51 }
0x25b8   :  { %v1307_v54 = vpack.c.bf16 %v2984_v52, %v2984_v52  ;;  %v1380_v18 = vrot.slane %v2984_v52, 4 }
0x25ba   :  { %v1309_v58 = vrot.slane %v1307_v54, 2 }
0x25bc   :  { %1310 = vrot.lane.b32.xlu1 %v1309_v58, %s2540_s19 }
0x262e   :  { %v1311_v35 = vpop.permute.xlu1 %1310 }
0x262f   :  { %2295 = vmatmul.mubr.msk.bf16.vlgmr.msra.gmra.mrb[32].mxu1 %vm229_vm2, %v1311_v35 }
0x2702   :  { %v1349_v59 = vpop.f32.mrb[32].mxu1 }
0x2703   :  { %v1350_v62 = vadd.f32 %v2534_v5, %v1349_v59  ;;  %v2296_v3 = vpop.f32.mrb[33].mxu1 }
0x2704   :  { %v1352_v4 = vpop.f32.mrb[34].mxu1  ;;  %v2343_v3 = vpack.i.bf16 %v2755_v30, %v450_v25  ;;  %v3372_v30 = vlaneseq }
0x2705   :  { %1363 = vrot.lane.b32.xlu0 %v1350_v62, %s2539_s2  ;;  %v2297_v20 = vpop.f32.mrb[35].mxu1  ;;  %v1355_v9 = vadd.f32 %v1350_v62, %v203_v8  ;;  %v2353_v4 = vpack.i.bf16 %v1380_v18, %v2923_v53 }
0x2706   :  { %v2363_v20 = vpack.i.bf16 %v1225_v6, %v605_v24 }
0x2707   :  { %v2078_v11 = vmul.f32 -1.442695, %v1355_v9 }
0x2709   :  { %2514 = vpow2.f32 %v2078_v11  ;;  %v1522_v11 = vrot.slane %v683_v57, 4  ;;  %v2383_v57 = vpack.i.bf16 %v1523_v29, %v1519_v1 }
0x2713   :  { %v2515_v13 = vpop.eup %2514 }
0x2714   :  { %v1359_v14 = vadd.f32 1.0, %v2515_v13 }
0x2716   :  { %2516 = vrcp.f32 %v1359_v14 }
0x2720   :  { %v2517_v15 = vpop.eup %2516 }
0x2721   :  { %v1373_v34 = vsub.f32 1.0, %v2517_v15  ;;  %v1382_v37 = vmul.f32 %v2517_v15, %v1380_v18 }
0x2777   :  { %v1364_v22 = vpop.permute.xlu0 %1363 }
0x2778   :  { %v1366_v23 = vmul.f32 %v2517_v15, %v1364_v22 }
0x277a   :  { %1368 = vrot.lane.b32.xlu1 %v1366_v23, %s2539_s2 }
0x27ec   :  { %v1369_v21 = vpop.permute.xlu1 %1368 }
0x27ed   :  { %v1371_v19 = vadd.f32 %v1369_v21, %v203_v8 }
0x27ef   :  { %2518 = vtanh.f32 %v1371_v19 }
0x27f9   :  { %v2519_v16 = vpop.eup %2518 }
0x27fa   :  { %1375 = vrot.lane.b32.xlu0 %v2519_v16, %s2540_s19 }
0x286c   :  { %v1376_v28 = vpop.permute.xlu0 %1375 }
0x286d   :  { %v1378_v33 = vmul.f32 %v1376_v28, %v1373_v34 }
0x286f   :  { %v1383_v41 = vadd.f32 %v1382_v37, %v1378_v33 }
0x2871   :  { %v1384_v31 = vpack.c.bf16 %v1383_v41, %v1383_v41  ;;  %v2388_v60 = vpack.i.bf16 %v1383_v41, %v2843_v38  ;;  %v1458_v32 = vrot.slane %v1383_v41, 4 }
0x2873   :  { %1386 = vrot.lane.b32.xlu1 %v1384_v31, %s2540_s19  ;;  %v1517_v24 = vrot.slane %v1458_v32, 4 }
0x2875   :  { %v2358_v6 = vpack.i.bf16 %v1521_v39, %v1517_v24 }
0x28e5   :  { %v1387_v42 = vpop.permute.xlu1 %1386 }
0x28e6   :  { %2303 = vmatmul.mubr.msk.bf16.vlgmr.msra.gmra.mrb[32].mxu0 %vm229_vm2, %v1387_v42 }
0x28e7   :  { %2316 = vmatprep.mubr.msk.bf16.mxu0 %vm2537_vm0, %v3373_v0 }
0x29b9   :  { %v1425_v43 = vpop.f32.mrb[32].mxu0 }
0x29ba   :  { %v1426_v45 = vadd.f32 %v2534_v5, %v1425_v43  ;;  %v2304_v10 = vpop.f32.mrb[33].mxu0  ;;  %v2338_v5 = vpack.i.bf16 %v915_v40, %v2705_v36 }
0x29bb   :  { %v1428_v46 = vpop.f32.mrb[34].mxu0 }
0x29bc   :  { %v1432_v48 = vrot.slane %v1426_v45, 4  ;;  %v2305_v50 = vpop.f32.mrb[35].mxu0 }
0x29be   :  { %1441 = vrot.lane.b32.xlu0 %v1432_v48, %s2539_s2  ;;  %v1434_v51 = vadd.f32 %v1432_v48, %v203_v8 }
0x29c0   :  { %v2080_v52 = vmul.f32 -1.442695, %v1434_v51 }
0x29c2   :  { %2520 = vpow2.f32 %v2080_v52 }
0x29cc   :  { %v2521_v54 = vpop.eup %2520 }
0x29cd   :  { %v1438_v58 = vadd.f32 1.0, %v2521_v54 }
0x29cf   :  { %2522 = vrcp.f32 %v1438_v58 }
0x29d9   :  { %v2523_v35 = vpop.eup %2522 }
0x29da   :  { %v1451_v63 = vsub.f32 1.0, %v2523_v35  ;;  %v1460_v17 = vmul.f32 %v2523_v35, %v1458_v32 }
0x2a30   :  { %v1442_v59 = vpop.permute.xlu0 %1441 }
0x2a31   :  { %v1444_v62 = vmul.f32 %v2523_v35, %v1442_v59 }
0x2a33   :  { %1446 = vrot.lane.b32.xlu1 %v1444_v62, %s2539_s2 }
0x2a37   :  { %2339 = vrot.lane.b32.xlu1 %v2338_v5, %s2540_s19 }
0x2a3b   :  { %2344 = vrot.lane.b32.xlu1 %v2343_v3, %s2540_s19 }
0x2a3f   :  { %2354 = vrot.lane.b32.xlu1 %v2353_v4, %s2540_s19 }
0x2a43   :  { %2364 = vrot.lane.b32.xlu1 %v2363_v20, %s2540_s19 }
0x2a47   :  { %2374 = vrot.lane.b32.xlu1 %v2373_v7, %s2540_s19 }
0x2a4b   :  { %2389 = vrot.lane.b32.xlu1 %v2388_v60, %s2540_s19 }
0x2aa5   :  { %v1447_v25 = vpop.permute.xlu1 %1446 }
0x2aa6   :  { %v1449_v40 = vadd.f32 %v1447_v25, %v203_v8  ;;  %v1518_v8 = vrot.slane %v1303_v47, 4  ;;  %v1524_v47 = vrot.slane %v373_v56, 4 }
0x2aa8   :  { %2524 = vtanh.f32 %v1449_v40  ;;  %v2368_v13 = vpack.i.bf16 %v1522_v11, %v1518_v8  ;;  %v2393_v22 = vpack.i.bf16 %v1524_v47, %v1520_v2 }
0x2aa9   :  { %v3053_v23 = vpop.permute.xlu1 %2339 }
0x2aaa   :  { %v2342_v42 = vunpack.i.h.bf16 %v3053_v23  ;;  %v2341_v43 = vunpack.i.l.bf16 %v3053_v23 }
0x2aad   :  { %v2345_v53 = vpop.permute.xlu1 %2344 }
0x2aae   :  { %v2347_v12 = vunpack.i.h.bf16 %v2345_v53  ;;  %v2346_v46 = vunpack.i.l.bf16 %v2345_v53 }
0x2ab1   :  { %v3055_v26 = vpop.permute.xlu1 %2354 }
0x2ab2   :  { %v2525_v9 = vpop.eup %2524  ;;  %v2357_v36 = vunpack.i.h.bf16 %v3055_v26  ;;  %v2356_v48 = vunpack.i.l.bf16 %v3055_v26 }
0x2ab3   :  { %1453 = vrot.lane.b32.xlu0 %v2525_v9, %s2540_s19 }
0x2ab5   :  { %v3057_v21 = vpop.permute.xlu1 %2364 }
0x2ab6   :  { %v2367_v28 = vunpack.i.h.bf16 %v3057_v21  ;;  %v2366_v33 = vunpack.i.l.bf16 %v3057_v21 }
0x2ab7   :  { %2349 = vrot.lane.b32.xlu0 %v2348_v61, %s2540_s19 }
0x2ab9   :  { %v2375_v55 = vpop.permute.xlu1 %2374 }
0x2aba   :  { %v2376_v56 = vunpack.i.l.bf16 %v2375_v55  ;;  %v2377_v16 = vunpack.i.h.bf16 %v2375_v55 }
0x2abb   :  { %2359 = vrot.lane.b32.xlu0 %v2358_v6, %s2540_s19 }
0x2abd   :  { %v2390_v18 = vpop.permute.xlu1 %2389 }
0x2abe   :  { %v2392_v31 = vunpack.i.h.bf16 %v2390_v18  ;;  %v2391_v35 = vunpack.i.l.bf16 %v2390_v18 }
0x2abf   :  { %2369 = vrot.lane.b32.xlu0 %v2368_v13, %s2540_s19 }
0x2b25   :  { %v1454_v27 = vpop.permute.xlu0 %1453 }
0x2b26   :  { %v1456_v49 = vmul.f32 %v1454_v27, %v1451_v63 }
0x2b28   :  { %v1461_v14 = vadd.f32 %v1460_v17, %v1456_v49 }
0x2b29   :  { %v3059_v19 = vpop.permute.xlu0 %2349 }
0x2b2a   :  { %v1463_v15 = vrot.slane %v1461_v14, 4  ;;  %v2352_v10 = vunpack.i.h.bf16 %v3059_v19  ;;  %v2351_v51 = vunpack.i.l.bf16 %v3059_v19 }
0x2b2c   :  { %v2378_v38 = vpack.i.bf16 %v1463_v15, %v2883_v44  ;;  %v3062_v44 = vand.u32 127, %v3372_v30 }
0x2b2d   :  { %v2360_v34 = vpop.permute.xlu0 %2359 }
0x2b2e   :  { %2379 = vrot.lane.b32.xlu0 %v2378_v38, %s2540_s19  ;;  %vm1466_vm3 = vcmp.lt.s32.totalorder %v3062_v44, 16  ;;  %v2362_v4 = vunpack.i.h.bf16 %v2360_v34  ;;  %v2361_v25 = vunpack.i.l.bf16 %v2360_v34 }
0x2b2f   :  { %v3071_v37 = vsel %vm1466_vm3, %v2347_v12, %v2357_v36  ;;  %v3076_v41 = vsel %vm1466_vm3, %v2376_v56, %v2367_v28  ;;  %v3082_v45 = vsel %vm1466_vm3, %v2377_v16, %v2366_v33  ;;  %v3095_v3 = vsel %vm1466_vm3, %v2392_v31, %v2346_v46 }
0x2b30   :  { %v1584_v50 = vrot.slane %v3071_v37, 6  ;;  %v1620_v52 = vrot.slane %v3071_v37, 7  ;;  %v1689_v54 = vrot.slane %v3071_v37, 1  ;;  %v1608_v62 = vrot.slane %v3082_v45, 4 }
0x2b31   :  { %v2370_v59 = vpop.permute.xlu0 %2369  ;;  %v1624_v5 = vrot.slane %v3076_v41, 5  ;;  %v1638_v20 = vrot.slane %v3082_v45, 5  ;;  %v1658_v7 = vrot.slane %v3076_v41, 6  ;;  %v3101_v60 = vsel %vm1466_vm3, %v2391_v35, %v2352_v10 }
0x2b32   :  { %2384 = vrot.lane.b32.xlu0 %v2383_v57, %s2540_s19  ;;  %v1672_v40 = vrot.slane %v3082_v45, 6  ;;  %v1692_v32 = vrot.slane %v3076_v41, 7  ;;  %v3109_v9 = vsel %vm1466_vm3, %v2356_v48, %v2351_v51  ;;  %v2372_v61 = vunpack.i.h.bf16 %v2370_v59 }
0x2b33   :  { %v1706_v24 = vrot.slane %v3082_v45, 7  ;;  %v1642_v6 = vrot.slane %v3095_v3, 3  ;;  %v2371_v8 = vunpack.i.l.bf16 %v2370_v59  ;;  %v1676_v11 = vrot.slane %v3095_v3, 4 }
0x2b34   :  { %v1558_v27 = vsel %vm1466_vm3, %v2352_v10, %v2362_v4  ;;  %v1604_v17 = vrot.slane %v3109_v9, 6  ;;  %v1628_v49 = vrot.slane %v3101_v60, 3  ;;  %v1634_v14 = vrot.slane %v3109_v9, 7 }
0x2b35   :  { %v1550_v15 = vsel %vm1466_vm3, %v2346_v46, %v2361_v25  ;;  %v1662_v38 = vrot.slane %v3101_v60, 4  ;;  %v1696_v1 = vrot.slane %v3101_v60, 5  ;;  %v1703_v29 = vrot.slane %v3109_v9, 1 }
0x2b36   :  { %2394 = vrot.lane.b32.xlu0 %v2393_v22, %s2540_s19  ;;  %v3129_v57 = vsel %vm1466_vm3, %v2367_v28, %v2372_v61  ;;  %v1602_v2 = vrot.slane %v1558_v27, 7  ;;  %v1667_v47 = vrot.slane %v1558_v27, 1  ;;  %v1701_v22 = vrot.slane %v1558_v27, 2 }
0x2b37   :  { %v3133_v53 = vsel %vm1466_vm3, %v2366_v33, %v2371_v8  ;;  %v1581_v55 = vrot.slane %v1550_v15, 7  ;;  %v1653_v56 = vrot.slane %v1550_v15, 1  ;;  %v1687_v18 = vrot.slane %v1550_v15, 2 }
0x2b38   :  { %v1606_v34 = vrot.slane %v3129_v57, 5  ;;  %v1636_v31 = vrot.slane %v3129_v57, 6  ;;  %v1670_v28 = vrot.slane %v3129_v57, 7  ;;  %v1587_v10 = vrot.slane %v3133_v53, 5 }
0x2b39   :  { %v1622_v46 = vrot.slane %v3133_v53, 6 }
0x2ba0   :  { %v2380_v21 = vpop.permute.xlu0 %2379 }
0x2ba1   :  { %v2382_v12 = vunpack.i.h.bf16 %v2380_v21  ;;  %v2381_v16 = vunpack.i.l.bf16 %v2380_v21 }
0x2ba3   :  { %v1549_v33 = vsel %vm1466_vm3, %v2341_v43, %v2382_v12  ;;  %v1557_v48 = vsel %vm1466_vm3, %v2381_v16, %v2342_v42  ;;  %v1656_v16 = vrot.slane %v3133_v53, 7 }
0x2ba4   :  { %v1583_v35 = vsel %vm1582_vm4, %v1581_v55, %v1549_v33  ;;  %v1603_v59 = vsel %vm1582_vm4, %v1602_v2, %v1557_v48  ;;  %v1618_v4 = vrot.slane %v1549_v33, 1  ;;  %v1632_v25 = vrot.slane %v1557_v48, 1  ;;  %v2385_v61 = vpop.permute.xlu0 %2384 }
0x2ba5   :  { %v1586_v8 = vsel %vm1585_vm5, %v1584_v50, %v1583_v35  ;;  %v1605_v43 = vsel %vm1585_vm5, %v1604_v17, %v1603_v59  ;;  %v1652_v21 = vrot.slane %v1549_v33, 2  ;;  %v1666_v30 = vrot.slane %v1557_v48, 2 }
0x2ba6   :  { %v3154_v55 = vsel %vm1588_vm6, %v1587_v10, %v1586_v8  ;;  %v3157_v2 = vsel %vm1588_vm6, %v1606_v34, %v1605_v43  ;;  %v1619_v0 = vsel %vm1582_vm4, %v1550_v15, %v1618_v4  ;;  %v1686_v50 = vrot.slane %v1549_v33, 3 }
0x2ba7   :  { %v1654_v63 = vsel %vm1582_vm4, %v1653_v56, %v1652_v21  ;;  %v1668_v58 = vsel %vm1582_vm4, %v1667_v47, %v1666_v30  ;;  %v1700_v35 = vrot.slane %v1557_v48, 3  ;;  %v2387_v17 = vunpack.i.h.bf16 %v2385_v61 }
0x2ba8   :  { %v2386_v59 = vunpack.i.l.bf16 %v2385_v61  ;;  %v2395_v39 = vpop.permute.xlu0 %2394  ;;  %v1655_v13 = vsel %vm1585_vm5, %v3071_v37, %v1654_v63  ;;  %v1669_v10 = vsel %vm1585_vm5, %v3109_v9, %v1668_v58  ;;  %v1633_v34 = vsel %vm1582_vm4, %v1558_v27, %v1632_v25 }
0x2ba9   :  { %v1688_v8 = vsel %vm1582_vm4, %v1687_v18, %v1686_v50  ;;  %v2397_v15 = vunpack.i.h.bf16 %v2395_v39  ;;  %v2396_v4 = vunpack.i.l.bf16 %v2395_v39  ;;  %v1562_v63 = vsel %vm1466_vm3, %v2357_v36, %v2387_v17 }
0x2baa   :  { %v3172_v30 = vsel %vm1466_vm3, %v2351_v51, %v2386_v59  ;;  %v1657_v47 = vsel %vm1588_vm6, %v1656_v16, %v1655_v13  ;;  %v1671_v58 = vsel %vm1588_vm6, %v1670_v28, %v1669_v10  ;;  %v1702_v27 = vsel %vm1582_vm4, %v1701_v22, %v1700_v35 }
0x2bab   :  { %v1593_v56 = vrot.slane %v3172_v30, 3  ;;  %v1610_v39 = vrot.slane %v1562_v63, 3  ;;  %v1626_v19 = vrot.slane %v3172_v30, 4  ;;  %v1640_v18 = vrot.slane %v1562_v63, 4 }
0x2bac   :  { %v1660_v51 = vrot.slane %v3172_v30, 5  ;;  %v1674_v33 = vrot.slane %v1562_v63, 5  ;;  %v1694_v26 = vrot.slane %v3172_v30, 6  ;;  %v3189_v36 = vsel %vm1466_vm3, %v2342_v42, %v2396_v4 }
0x2bad   :  { %v1564_v13 = vsel %vm1466_vm3, %v2382_v12, %v2397_v15  ;;  %v1659_v22 = vsel %vm1591_vm8, %v1658_v7, %v1657_v47  ;;  %v1673_v28 = vsel %vm1591_vm8, %v1672_v40, %v1671_v58  ;;  %v1708_v48 = vrot.slane %v1562_v63, 6  ;;  %v2424_v47 = vld [vmem:[%s3357_s6] sm:$0xff]  }
0x2bae   :  { %v1614_v25 = vrot.slane %v1564_v13, 1  ;;  %v1661_v61 = vsel %vm1594_vm7, %v1660_v51, %v1659_v22  ;;  %v1664_v23 = vrot.slane %v3189_v36, 3  ;;  %v1675_v44 = vsel %vm1594_vm7, %v1674_v33, %v1673_v28  ;;  %2308 = vmatprep.mubr.msk.bf16.mxu1 %vm1739_vm11, %v2424_v47 }
0x2baf   :  { %v1663_v42 = vsel %vm1597_vm9, %v1662_v38, %v1661_v61  ;;  %v1678_v12 = vrot.slane %v1564_v13, 3  ;;  %v1621_v7 = vsel %vm1585_vm5, %v1620_v52, %v1619_v0  ;;  %v1677_v40 = vsel %vm1597_vm9, %v1676_v11, %v1675_v44 }
0x2bb0   :  { %v1665_v43 = vsel %vm1600_vm10, %v1664_v23, %v1663_v42  ;;  %v1623_v21 = vsel %vm1588_vm6, %v1622_v46, %v1621_v7  ;;  %v1630_v16 = vrot.slane %v3189_v36, 2  ;;  %v1635_v0 = vsel %vm1585_vm5, %v1634_v14, %v1633_v34 }
0x2bb1   :  { %v1679_v50 = vsel %vm1600_vm10, %v1678_v12, %v1677_v40  ;;  %v1625_v38 = vsel %vm1591_vm8, %v1624_v5, %v1623_v21  ;;  %v1644_v52 = vrot.slane %v1564_v13, 2  ;;  %v1637_v11 = vsel %vm1588_vm6, %v1636_v31, %v1635_v0 }
0x2bb2   :  { %v2403_v35 = vpack.i.bf16 %v1679_v50, %v1665_v43  ;;  %v1627_v17 = vsel %vm1594_vm7, %v1626_v19, %v1625_v38  ;;  %v1690_v46 = vsel %vm1585_vm5, %v1689_v54, %v1688_v8  ;;  %v1639_v14 = vsel %vm1591_vm8, %v1638_v20, %v1637_v11  ;;  %v2425_v43 = vld [vmem:[%s3357_s6 + $0x8] ss:$0 sps:$4 sm:$0xff]  }
0x2bb3   :  { %v1629_v5 = vsel %vm1597_vm9, %v1628_v49, %v1627_v17  ;;  %v1691_v59 = vsel %vm1588_vm6, %v3133_v53, %v1690_v46  ;;  %v1698_v10 = vrot.slane %v3189_v36, 4  ;;  %v1641_v37 = vsel %vm1594_vm7, %v1640_v18, %v1639_v14 }
0x2bb4   :  { %2404 = vrot.lane.b32.xlu0 %v2403_v35, %s2539_s2  ;;  %v1631_v31 = vsel %vm1600_vm10, %v1630_v16, %v1629_v5  ;;  %v1693_v54 = vsel %vm1591_vm8, %v1692_v32, %v1691_v59  ;;  %v1704_v49 = vsel %vm1585_vm5, %v1703_v29, %v1702_v27  ;;  %v1643_v20 = vsel %vm1597_vm9, %v1642_v6, %v1641_v37  ;;  %v2426_v59 = vld [vmem:[%s3360_s8] sm:$0xff]   ;;  %v2427_v37 = vld [vmem:[%s3360_s8 + $0x8] sm:$0xff]   ;;  %s2545_s8 = smov 30  }
0x2bb5   :  { %v1695_v53 = vsel %vm1594_vm7, %v1694_v26, %v1693_v54  ;;  %v1705_v34 = vsel %vm1588_vm6, %v3129_v57, %v1704_v49  ;;  %v1712_v8 = vrot.slane %v1564_v13, 4  ;;  %v1599_v15 = vrot.slane %v3189_v36, 1  ;;  %2313 = vmatpush3.bf16.msra.mxu0 %v2426_v59 }
0x2bb6   :  { %v1645_v4 = vsel %vm1600_vm10, %v1644_v52, %v1643_v20  ;;  %v1707_v32 = vsel %vm1591_vm8, %v1706_v24, %v1705_v34  ;;  %v1609_v9 = vsel %vm1591_vm8, %v1608_v62, %v3157_v2  ;;  %v1697_v29 = vsel %vm1597_vm9, %v1696_v1, %v1695_v53 }
0x2bb7   :  { %v2398_v6 = vpack.i.bf16 %v1645_v4, %v1631_v31  ;;  %v1709_v57 = vsel %vm1594_vm7, %v1708_v48, %v1707_v32  ;;  %v1611_v63 = vsel %vm1594_vm7, %v1610_v39, %v1609_v9  ;;  %v1699_v24 = vsel %vm1600_vm10, %v1698_v10, %v1697_v29  ;;  %v1833_v4 = vld [vmem:[%s3361_s1] sm:$0xf] }
0x2bb8   :  { %v3379_v58 = vrot.slane %v3095_v3, 5  ;;  %v3380_v62 = vrot.slane %v3095_v3, 2  ;;  %v3381_v1 = vrot.slane %v3076_v41, 4  ;;  %v3382_v3 = vrot.slane %v3101_v60, 2  ;;  %v1804_v41 = vld [vmem:[%s3358_s7] sm:$0xff] }
0x2bb9   :  { %2399 = vrot.lane.b32.xlu1 %v2398_v6, %s2541_s30  ;;  %1807 = vperm.xlu0 %2413, %v1804_v41   ;;  %v3383_v40 = vmov 0.0   ;;  %v22_v0 = vstv %s3359_s10  ;;  %v2544_v49 = vmov 65535   ;;  %vm1838_vm3 = vcmask 244736   ;;  %v2085_v41 = vld [vmem:[%s3366_s9] ss:$0 sm:$0xff] }
0x2bba   :  { %v1711_v45 = vsel %vm1597_vm9, %v3379_v58, %v1709_v57  ;;  %v1613_v2 = vsel %vm1597_vm9, %v3380_v62, %v1611_v63  ;;  %v1592_v27 = vsel %vm1591_vm8, %v3381_v1, %v3154_v55  ;;  %23 = vst [vmem:[#allocation2] sm:$0x1] %v22_v0  ;;  %2314 = vmatprep.subr.bf16.mxu0 %v3383_v40  ;;  %v1869_v20 = vsel %vm1867_vm13, 4294967295, %v2544_v49  ;;  %v2428_v62 = vld [vmem:[%s3362_s15] sm:$0xff]  }
0x2bbb   :  { %v1713_v39 = vsel %vm1600_vm10, %v1712_v8, %v1711_v45  ;;  %v1615_v19 = vsel %vm1600_vm10, %v1614_v25, %v1613_v2  ;;  %v1595_v18 = vsel %vm1594_vm7, %v1593_v56, %v1592_v27  ;;  %v1870_v53 = vsel %vm1868_vm14, %v1869_v20, 0  ;;  %v2429_v2 = vld [vmem:[%s3362_s15 + $0x8] sm:$0xff]   ;;  %v1936_v27 = vld [vmem:[%s3364_s14] sm:$0x1] }
0x2bbc   :  { %v1598_v51 = vsel %vm1597_vm9, %v3382_v3, %v1595_v18  ;;  %v2408_v55 = vpack.i.bf16 %v1713_v39, %v1699_v24  ;;  %v1872_v8 = vand.u32 %v2427_v37, %v1870_v53  ;;  %vm1863_vm4 = vcmask 252928  }
0x2bbd   :  { %v1601_v33 = vsel %vm1600_vm10, %v1599_v15, %v1598_v51  ;;  %v24_v1 = vstv %s3363_s16  ;;  %v1937_v39 = vadd.f32 1e-05, %v1936_v27  ;;  %v1935_v51 = vld [vmem:[%s3365_s11] sm:$0x1]  ;;  %vm2028_vm6 = vcmask 3072  }
0x2bbe   :  { %2409 = vrot.lane.b32.xlu1 %v2408_v55, %s2540_s19  ;;  %2315 = vmatpush3.bf16.msra.mxu0 %v1872_v8  ;;  %25 = vst [vmem:[#allocation3] sm:$0x1] %v24_v1 }
0x2bbf   :  { %2526 = vrsqrt.f32 %v1937_v39 }
0x2bc1   :  { %v2089_v32 = vld [vmem:[#allocation2] ss:$0 sm:$0xff] }
0x2bc9   :  { %v2527_v3 = vpop.eup %2526 }
0x2c26   :  { %v2405_v30 = vpop.permute.xlu0 %2404 }
0x2c27   :  { %v2407_v13 = vunpack.i.h.bf16 %v2405_v30  ;;  %v2406_v60 = vunpack.i.l.bf16 %v2405_v30 }
0x2c2b   :  { %v2400_v26 = vpop.permute.xlu1 %2399 }
0x2c2c   :  { %v2402_v56 = vunpack.i.h.bf16 %v2400_v26  ;;  %v2401_v36 = vunpack.i.l.bf16 %v2400_v26 }
0x2c2e   :  { %v1721_v22 = vsel %vm229_vm2, %v1615_v19, %v2402_v56  ;;  %v1720_v28 = vsel %vm229_vm2, %v1601_v33, %v2401_v36  ;;  %v3384_v19 = vlaneseq  ;;  %v1939_v33 = vmul.f32 %v2527_v3, %v1935_v51 }
0x2c2f   :  { %v1722_v23 = vsel %vm128_vm1, %v1720_v28, %v2406_v60  ;;  %v1723_v42 = vsel %vm128_vm1, %v1721_v22, %v2407_v13  ;;  %vm1831_vm1 = vcmask 1042432   ;;  %v2090_v22 = vld [vmem:[%s3367_s13] ss:$0 sm:$0xff] }
0x2c30   :  { %v2410_v48 = vpop.permute.xlu1 %2409  ;;  %v1942_v18 = vshrl.u32 %v3384_v19, 7 }
0x2c31   :  { %v2412_v25 = vunpack.i.h.bf16 %v2410_v48  ;;  %v2411_v61 = vunpack.i.l.bf16 %v2410_v48 }
0x2c32   :  { %v1943_v30 = vsub.s32 0, %v1942_v18 }
0x2c33   :  { %v1725_v44 = vsel %vm1724_vm12, %v1722_v23, %v2411_v61  ;;  %v1726_v12 = vsel %vm1724_vm12, %v1723_v42, %v2412_v25  ;;  %v2091_v23 = vld [vmem:[%s3368_s12] ss:$0 sm:$0xff] }
0x2c34   :  { %v1727_v7 = vpack.c.bf16 %v1726_v12, %v1725_v44  ;;  %v1944_v48 = vrot.slane %v1939_v33, %v1943_v30 }
0x2c36   :  { %2306 = vmatprep.subr.bf16.mxu1 %v1727_v7 }
0x2c37   :  { %2307 = vmatpush3.bf16.msra.mxu1 %v1727_v7  ;;  %v2092_v7 = vld [vmem:[#allocation3] ss:$0 sm:$0xff] }
0x2c38   :  { %2320 = vmatprep.subr.bf16.mxu1 %v3383_v40  ;;  %v1808_v11 = vpop.permute.xlu0 %1807 }
0x2c3a   :  { %2309 = vmatmul.mubr.msk.bf16.vlgmr.msra.gmra.mrb[36].mxu1 %vm1739_vm11, %v2425_v43 }
0x2c3b   :  { %2324 = vmatprep.mubr.msk.bf16.mxu1 %vm2537_vm0, %v3383_v40  ;;  %vm1829_vm0 = vcmask 1041408   ;;  %2321 = vmatpush3.bf16.msra.mxu1 %v2428_v62 }
0x2c3c   :  { %2322 = vmatprep.subr.bf16.mxu1 %v3383_v40 }
0x2c3f   :  { %2323 = vmatpush3.bf16.msra.mxu1 %v2429_v2 }
0x2d0d   :  { %v2310_v21 = vpop.f32.mrb[36].mxu1 }
0x2d0e   :  { %v1780_v16 = vpop.f32.mrb[37].mxu1 }
0x2d0f   :  { %v2311_v50 = vpop.f32.mrb[38].mxu1 }
0x2d10   :  { %v1783_v38 = vpop.f32.mrb[39].mxu1 }
0x2d11   :  { %1795 = vrot.lane.b32.xlu1 %v1783_v38, %s2542_s21 }
0x2d15   :  { %1800 = vrot.lane.b32.xlu1 %v2310_v21, %s2543_s22 }
0x2d83   :  { %v1796_v52 = vpop.permute.xlu1 %1795 }
0x2d84   :  { %v1798_v35 = vadd.f32 %v1796_v52, %v1780_v16 }
0x2d87   :  { %v1801_v17 = vpop.permute.xlu1 %1800 }
0x2d88   :  { %v1803_v46 = vadd.f32 %v1801_v17, %v1798_v35 }
0x2d8a   :  { %v1810_v5 = vadd.f32 %v1808_v11, %v1803_v46 }
0x2d8c   :  { %v1811_v14 = vrot.slane %v1810_v5, 4 }
0x2d8e   :  { %v1812_v10 = vmax.f32 %v1810_v5, %v1811_v14 }
0x2d90   :  { %v1813_v31 = vrot.slane %v1812_v10, 2 }
0x2d92   :  { %v1814_v54 = vmax.f32 %v1812_v10, %v1813_v31 }
0x2d94   :  { %v1815_v34 = vrot.slane %v1814_v54, 1 }
0x2d96   :  { %v1816_v15 = vmax.f32 %v1814_v54, %v1815_v34 }
0x2d98   :  { %1821 = vrot.lane.b32.xlu1 %v1816_v15, %s2539_s2  ;;  %1818 = vrot.lane.b32.xlu0 %v1816_v15, %s2540_s19 }
0x2d9c   :  { %1824 = vrot.lane.b32.xlu0 %v1816_v15, %s2541_s30  ;;  %1835 = vrot.lane.b32.xlu1 %v1833_v4, %s2545_s8 }
0x2da0   :  { %1922 = vperm.xlu0 %2413, %v2089_v32  }
0x2e0a   :  { %v1822_v9 = vpop.permute.xlu1 %1821  ;;  %v1819_v6 = vpop.permute.xlu0 %1818 }
0x2e0b   :  { %v1828_v29 = vsel %vm1827_vm15, %v1816_v15, %v1819_v6 }
0x2e0c   :  { %v1830_v57 = vsel %vm1829_vm0, %v1828_v29, %v1822_v9 }
0x2e0e   :  { %v1825_v63 = vpop.permute.xlu0 %1824  ;;  %v1836_v47 = vpop.permute.xlu1 %1835 }
0x2e0f   :  { %v1832_v24 = vsel %vm1831_vm1, %v1830_v57, %v1825_v63 }
0x2e10   :  { %v1839_v58 = vsel %vm1838_vm3, %v1832_v24, %v1836_v47 }
0x2e11   :  { %v1840_v45 = vpack.c.bf16 %v1839_v58, %v1839_v58 }
0x2e13   :  { %2317 = vmatmul.mubr.msk.bf16.vlgmr.msra.gmra.mrb[36].mxu0 %vm1863_vm4, %v1840_v45 }
0x2e1f   :  { %v1923_v36 = vpop.permute.xlu0 %1922 }
0x2ee6   :  { %v1908_v55 = vpop.f32.mrb[36].mxu0 }
0x2ee7   :  { %v1909_v26 = vadd.f32 %v2085_v41, %v1908_v55  ;;  %v2318_v56 = vpop.f32.mrb[37].mxu0 }
0x2ee8   :  { %v1911_v13 = vpop.f32.mrb[38].mxu0 }
0x2ee9   :  { %vm1915_vm5 = vcmp.ge.f32.partialorder %v1909_v26, 0.0  ;;  %v1925_v60 = vmul.f32 %v1923_v36, %v1909_v26  ;;  %v2319_v28 = vpop.f32.mrb[39].mxu0 }
0x2eeb   :  { %v1926_v25 = vsel %vm1915_vm5, %v1909_v26, %v1925_v60 }
0x2eec   :  { %v1934_v61 = vsub.f32 %v1926_v25, %v2090_v22 }
0x2eee   :  { %v1946_v42 = vmul.f32 %v1944_v48, %v1934_v61 }
0x2ef0   :  { %v1954_v44 = vadd.f32 %v2091_v23, %v1946_v42 }
0x2ef2   :  { %v1955_v12 = vpack.c.bf16 %v1954_v44, %v1954_v44 }
0x2ef4   :  { %2325 = vmatmul.mubr.msk.bf16.vlgmr.msra.gmra.mrb[40].mxu1 %vm229_vm2, %v1955_v12 }
0x2fc7   :  { %v2016_v43 = vpop.f32.mrb[40].mxu1 }
0x2fc8   :  { %v2017_v40 = vadd.f32 %v2092_v7, %v2016_v43  ;;  %v2326_v21 = vpop.f32.mrb[41].mxu1 }
0x2fc9   :  { %v2019_v16 = vpop.f32.mrb[42].mxu1 }
0x2fca   :  { %v2096_v50 = vmul.f32 -1.442695, %v2017_v40  ;;  %v2327_v38 = vpop.f32.mrb[43].mxu1 }
0x2fcc   :  { %2528 = vpow2.f32 %v2096_v50 }
0x2fd6   :  { %v2529_v0 = vpop.eup %2528 }
0x2fd7   :  { %v2025_v52 = vadd.f32 1.0, %v2529_v0 }
0x2fd9   :  { %2530 = vrcp.f32 %v2025_v52 }
0x2fe3   :  { %v2531_v35 = vpop.eup %2530 }
0x2fe4   :  { %2029 = vst.msk [vmem:[%s3369_s17] sm:$0xf] %vm2028_vm6, %v2531_v35 }

</bundles_post_ra>
